<compile_context>
chip_gen: v7x
topology: tpu7x:2x2x1
jax: 0.10.0
libtpu: 0.0.40
codegen_flags: <defaults>
</compile_context>

<pallas_src>
import functools

import jax
import jax.numpy as jnp
from jax.experimental import pallas as pl
from jax.experimental.pallas import tpu as pltpu

EPS = 1e-5
LANE = 128


def _round_up(x, m):
    return (x + m - 1) // m * m


# ----------------------------- Pallas kernels ------------------------------

def _conv_bn_relu_kernel(x_ref, w_ref, b_ref, o_ref, *, offsets, ma):
    # out = relu( conv3x3(x) * bn_scale + bn_bias )   (scale folded into w)
    cout = o_ref.shape[-1]
    acc = jnp.zeros((ma, cout), jnp.float32)
    for t, off in enumerate(offsets):                       # 9 taps, unrolled
        acc = acc + jnp.dot(x_ref[0, off:off + ma, :], w_ref[t],
                            preferred_element_type=jnp.float32)
    o_ref[0] = jnp.maximum(acc + b_ref[...], 0.0).astype(o_ref.dtype)


def _conv_bn_proj_add_relu_kernel(h_ref, w_ref, b_ref, xs_ref, ws_ref, bs_ref,
                                  o_ref, *, offsets, ma):
    # out = relu( bn2(conv2(h)) + bn_s(conv1x1_s(x)) ), all BN scales folded.
    cout = o_ref.shape[-1]
    acc = jnp.zeros((ma, cout), jnp.float32)
    for t, off in enumerate(offsets):
        acc = acc + jnp.dot(h_ref[0, off:off + ma, :], w_ref[t],
                            preferred_element_type=jnp.float32)
    short = jnp.dot(xs_ref[0], ws_ref[...], preferred_element_type=jnp.float32)
    o_ref[0] = jnp.maximum(acc + b_ref[...] + short + bs_ref[...],
                           0.0).astype(o_ref.dtype)


def _conv_bn_id_add_relu_kernel(h_ref, w_ref, b_ref, xs_ref, o_ref, *,
                                offsets, ma):
    # out = relu( bn2(conv2(h)) + x )   -- identity shortcut, plain VPU add.
    cout = o_ref.shape[-1]
    acc = jnp.zeros((ma, cout), jnp.float32)
    for t, off in enumerate(offsets):
        acc = acc + jnp.dot(h_ref[0, off:off + ma, :], w_ref[t],
                            preferred_element_type=jnp.float32)
    o_ref[0] = jnp.maximum(acc + b_ref[...] + xs_ref[0], 0.0).astype(o_ref.dtype)


# ----------------------------- pallas_call glue -----------------------------

_CPARAMS = pltpu.CompilerParams(
    dimension_semantics=("parallel",),        # batch axis -> megacore sharding
    vmem_limit_bytes=32 * 1024 * 1024,
)


def _call_conv1(x_flat, w, b, offsets, ma):
    n, mx, cin = x_flat.shape
    cp = w.shape[-1]
    return pl.pallas_call(
        functools.partial(_conv_bn_relu_kernel, offsets=offsets, ma=ma),
        out_shape=jax.ShapeDtypeStruct((n, ma, cp), jnp.bfloat16),
        grid=(n,),
        in_specs=[
            pl.BlockSpec((1, mx, cin), lambda i: (i, 0, 0)),
            pl.BlockSpec((9, cin, cp), lambda i: (0, 0, 0)),    # resident
            pl.BlockSpec((1, cp), lambda i: (0, 0)),
        ],
        out_specs=pl.BlockSpec((1, ma, cp), lambda i: (i, 0, 0)),
        compiler_params=_CPARAMS,
    )(x_flat, w, b)


def _call_conv2_proj(h_flat, w, b, xs, ws, bs, offsets, ma):
    n, mh, ck = h_flat.shape
    cp = w.shape[-1]
    cs = xs.shape[-1]
    return pl.pallas_call(
        functools.partial(_conv_bn_proj_add_relu_kernel, offsets=offsets, ma=ma),
        out_shape=jax.ShapeDtypeStruct((n, ma, cp), jnp.float32),
        grid=(n,),
        in_specs=[
            pl.BlockSpec((1, mh, ck), lambda i: (i, 0, 0)),
            pl.BlockSpec((9, ck, cp), lambda i: (0, 0, 0)),
            pl.BlockSpec((1, cp), lambda i: (0, 0)),
            pl.BlockSpec((1, ma, cs), lambda i: (i, 0, 0)),
            pl.BlockSpec((cs, cp), lambda i: (0, 0)),
            pl.BlockSpec((1, cp), lambda i: (0, 0)),
        ],
        out_specs=pl.BlockSpec((1, ma, cp), lambda i: (i, 0, 0)),
        compiler_params=_CPARAMS,
    )(h_flat, w, b, xs, ws, bs)


def _call_conv2_id(h_flat, w, b, xs, offsets, ma):
    n, mh, ck = h_flat.shape
    cp = w.shape[-1]
    return pl.pallas_call(
        functools.partial(_conv_bn_id_add_relu_kernel, offsets=offsets, ma=ma),
        out_shape=jax.ShapeDtypeStruct((n, ma, cp), jnp.float32),
        grid=(n,),
        in_specs=[
            pl.BlockSpec((1, mh, ck), lambda i: (i, 0, 0)),
            pl.BlockSpec((9, ck, cp), lambda i: (0, 0, 0)),
            pl.BlockSpec((1, cp), lambda i: (0, 0)),
            pl.BlockSpec((1, ma, cp), lambda i: (i, 0, 0)),
        ],
        out_specs=pl.BlockSpec((1, ma, cp), lambda i: (i, 0, 0)),
        compiler_params=_CPARAMS,
    )(h_flat, w, b, xs)


# ------------------------------ JAX wrapper ---------------------------------

def _out_hw(h, w, s):
    # 3x3 conv, pad=1, stride s
    return (h - 1) // s + 1, (w - 1) // s + 1


def _to_tap_layout(x_nhwc, stride, ho, wo):
    """Zero-pad (3x3, pad=1), stride-phase decompose and flatten to 2D rows.

    Returns (flat, offsets, ma, lw):
      flat:    (N, s*s*(Lh+1)*Lw, C); each 3x3 tap is a contiguous row window.
      offsets: row offset per tap t = dy*3+dx so that flat[:, off + r, :] is
               the conv input for accumulator row r (r = i*lw + j, output
               (i, j); columns j >= wo are discarded garbage).
      ma:      ho*lw accumulator rows;  lw: row pitch of the output geometry.
    """
    n, h, w, c = x_nhwc.shape
    s = stride
    omax = 2 // s
    lh = max(ho + omax, -(-(h + 2) // s))
    lw = max(wo + omax, -(-(w + 2) // s))
    xp = jnp.pad(x_nhwc, ((0, 0), (1, lh * s - h - 1), (1, lw * s - w - 1), (0, 0)))
    ph = xp.reshape(n, lh, s, lw, s, c).transpose(0, 2, 4, 1, 3, 5)
    ph = ph.reshape(n, s * s, lh, lw, c)
    ph = jnp.pad(ph, ((0, 0), (0, 0), (0, 1), (0, 0), (0, 0)))   # safety row
    flat = ph.reshape(n, s * s * (lh + 1) * lw, c)
    seg = (lh + 1) * lw
    offsets = tuple(((dy % s) * s + (dx % s)) * seg + (dy // s) * lw + (dx // s)
                    for dy in range(3) for dx in range(3))
    return flat, offsets, ho * lw, lw


def _fold_bn(gamma, beta, mean, var):
    scale = gamma / jnp.sqrt(var + EPS)
    bias = beta - mean * scale
    return scale, bias


def _conv3x3_to_taps(w_oihw, scale, cp, k_pad=None):
    # (Cout, Cin, 3, 3) -> (9, Cin(pad), Cout pad), BN scale folded in, bf16.
    cout, cin = w_oihw.shape[:2]
    w = jnp.transpose(w_oihw, (2, 3, 1, 0)).reshape(9, cin, cout)
    w = w * scale[None, None, :]
    kp = cin if k_pad is None else k_pad
    w = jnp.pad(w, ((0, 0), (0, kp - cin), (0, cp - cout)))
    return w.astype(jnp.bfloat16)


def _pad_bias(bias, cp):
    return jnp.pad(bias, (0, cp - bias.shape[0])).reshape(1, cp).astype(jnp.float32)


def basic_block_forward(x_nchw, params, stride=1):
    """Pallas implementation of BasicBlock.forward (NCHW in, NCHW out)."""
    in_planes = x_nchw.shape[1]
    planes = params["conv1_w"].shape[0]
    cp = _round_up(planes, LANE)                       # lane-dense output channels

    x = jnp.transpose(x_nchw, (0, 2, 3, 1)).astype(jnp.float32)   # NHWC
    n, h, w, _ = x.shape
    ho, wo = _out_hw(h, w, stride)

    # --- conv1 (3x3, stride) + bn1 + relu ---
    s1, b1 = _fold_bn(params["bn1_g"], params["bn1_b"],
                      params["bn1_m"], params["bn1_v"])
    w1 = _conv3x3_to_taps(params["conv1_w"], s1, cp)
    b1 = _pad_bias(b1, cp)
    x1_flat, offs1, ma1, lw1 = _to_tap_layout(x.astype(jnp.bfloat16), stride, ho, wo)
    h_flat = _call_conv1(x1_flat, w1, b1, offs1, ma1)             # (N, ma1, cp) bf16
    h_nhwc = h_flat.reshape(n, ho, lw1, cp)[:, :, :wo, :]         # drop garbage cols

    # --- conv2 (3x3, stride 1) + bn2 + shortcut + relu ---
    s2, b2 = _fold_bn(params["bn2_g"], params["bn2_b"],
                      params["bn2_m"], params["bn2_v"])
    w2 = _conv3x3_to_taps(params["conv2_w"], s2, cp, k_pad=cp)
    b2 = _pad_bias(b2, cp)
    h2_flat, offs2, ma2, lw2 = _to_tap_layout(h_nhwc, 1, ho, wo)

    if stride != 1 or in_planes != planes:
        # projection shortcut: 1x1 conv (stride) + BN, fused as one extra matmul
        ss, bs = _fold_bn(params["sc_bn_g"], params["sc_bn_b"],
                          params["sc_bn_m"], params["sc_bn_v"])
        ws = params["sc_w"].reshape(planes, in_planes).T * ss[None, :]
        ws = jnp.pad(ws, ((0, 0), (0, cp - planes))).astype(jnp.bfloat16)
        bs = _pad_bias(bs, cp)
        xs = x[:, ::stride, ::stride, :]                          # (N, ho, wo, Cin)
        xs = jnp.pad(xs, ((0, 0), (0, 0), (0, lw2 - wo), (0, 0))).astype(jnp.bfloat16)
        xs = xs.reshape(n, ma2, in_planes)
        out_flat = _call_conv2_proj(h2_flat, w2, b2, xs, ws, bs, offs2, ma2)
    else:
        # identity shortcut: plain residual add in the epilogue
        xs = jnp.pad(x, ((0, 0), (0, 0), (0, lw2 - wo), (0, cp - planes)))
        xs = xs.reshape(n, ma2, cp)                               # f32 residual
        out_flat = _call_conv2_id(h2_flat, w2, b2, xs, offs2, ma2)

    out = out_flat.reshape(n, ho, lw2, cp)[:, :, :wo, :planes]
    return jnp.transpose(out, (0, 3, 1, 2))                       # back to NCHW


# ------------------------- reference & param init ---------------------------

def _ref_forward(x, params, stride, in_planes, planes):
    """Pure-JAX (lax.conv) reference reproducing the PyTorch forward (eval BN)."""
    def conv(a, w, s, pad):
        return jax.lax.conv_general_dilated(
            a, w, (s, s), [(pad, pad), (pad, pad)],
            dimension_numbers=("NCHW", "OIHW", "NCHW"))

    def bn(a, g, b, m, v):
        g, b, m, v = (t[None, :, None, None] for t in (g, b, m, v))
        return (a - m) / jnp.sqrt(v + EPS) * g + b

    out = jax.nn.relu(bn(conv(x, params["conv1_w"], stride, 1),
                         params["bn1_g"], params["bn1_b"],
                         params["bn1_m"], params["bn1_v"]))
    out = bn(conv(out, params["conv2_w"], 1, 1),
             params["bn2_g"], params["bn2_b"], params["bn2_m"], params["bn2_v"])
    if stride != 1 or in_planes != planes:
        sc = bn(conv(x, params["sc_w"], stride, 0),
                params["sc_bn_g"], params["sc_bn_b"],
                params["sc_bn_m"], params["sc_bn_v"])
    else:
        sc = x
    return jax.nn.relu(out + sc)


def init_params(key, in_planes, planes):
    ks = jax.random.split(key, 12)
    return {
        "conv1_w": 0.2 * jax.random.normal(ks[0], (planes, in_planes, 3, 3), jnp.float32),
        "bn1_g": 0.5 + jax.random.uniform(ks[1], (planes,), jnp.float32),
        "bn1_b": 0.1 * jax.random.normal(ks[2], (planes,), jnp.float32),
        "bn1_m": 0.1 * jax.random.normal(ks[3], (planes,), jnp.float32),
        "bn1_v": 0.5 + jax.random.uniform(ks[4], (planes,), jnp.float32),
        "conv2_w": 0.2 * jax.random.normal(ks[5], (planes, planes, 3, 3), jnp.float32),
        "bn2_g": 0.5 + jax.random.uniform(ks[6], (planes,), jnp.float32),
        "bn2_b": 0.1 * jax.random.normal(ks[7], (planes,), jnp.float32),
        "bn2_m": 0.1 * jax.random.normal(ks[8], (planes,), jnp.float32),
        "bn2_v": 0.5 + jax.random.uniform(ks[9], (planes,), jnp.float32),
        "sc_w": 0.2 * jax.random.normal(ks[10], (planes, in_planes, 1, 1), jnp.float32),
        "sc_bn_g": jnp.ones((planes,), jnp.float32),
        "sc_bn_b": jnp.zeros((planes,), jnp.float32),
        "sc_bn_m": 0.1 * jax.random.normal(ks[11], (planes,), jnp.float32),
        "sc_bn_v": jnp.ones((planes,), jnp.float32),
    }


# ---------------------------------- main -------------------------------------

if __name__ == "__main__":
    key = jax.random.PRNGKey(0)
    configs = [
        # (in_planes, planes, H, W, stride)
        (4, 8, 16, 16, 1),   # projection shortcut (channel change)
        (8, 8, 16, 16, 1),   # identity shortcut (plain residual add)
        (4, 8, 16, 16, 2),   # strided conv + projection shortcut
    ]
    for idx, (cin, cout, H, W, stride) in enumerate(configs):
        kx, kp, key = jax.random.split(key, 3)
        x = jax.random.normal(kx, (2, cin, H, W), jnp.float32)
        params = init_params(kp, cin, cout)

        out = jax.block_until_ready(basic_block_forward(x, params, stride=stride))
        ref = jax.block_until_ready(_ref_forward(x, params, stride, cin, cout))

        assert out.shape == ref.shape, (idx, out.shape, ref.shape)
        err = float(jnp.max(jnp.abs(out - ref)))
        # bf16 matmul operands (f32 accumulation) -> slightly loosened tolerance
        assert jnp.allclose(out, ref, atol=5e-2, rtol=5e-2), (idx, err)

    print("KERNEL_OK")
</pallas_src>

<mosaic_0001>
module attributes {stable_mosaic.version = 11 : i64} {
  func.func @_conv_bn_relu_kernel(%arg0: i32, %arg1: memref<1x342x4xbf16, #tpu.memory_space<vmem>>, %arg2: memref<9x4x128xbf16, #tpu.memory_space<vmem>>, %arg3: memref<1x128xf32, #tpu.memory_space<vmem>>, %arg4: memref<1x288x128xbf16, #tpu.memory_space<vmem>>) attributes {dimension_semantics = [#tpu.dimension_semantics<parallel>], iteration_bounds = array<i64: 2>, scalar_prefetch = 0 : i64, scratch_operands = 0 : i64, tpu.core_type = #tpu.core_type<tc>, window_params = [{transform_indices = @transform_0, window_bounds = array<i64: 1, 342, 4>}, {pipeline_mode = #tpu.pipeline_mode<synchronous>, transform_indices = @transform_1, window_bounds = array<i64: 9, 4, 128>}, {pipeline_mode = #tpu.pipeline_mode<synchronous>, transform_indices = @transform_2, window_bounds = array<i64: 1, 128>}, {transform_indices = @transform_3, window_bounds = array<i64: 1, 288, 128>}]} {
    %cst = arith.constant 0.000000e+00 : f32
    %0 = vector.broadcast %cst : f32 to vector<288x128xf32>
    %c0 = arith.constant 0 : index
    %c0_0 = arith.constant 0 : index
    %c0_1 = arith.constant 0 : index
    %1 = vector.load %arg1[%c0, %c0_0, %c0_1] : memref<1x342x4xbf16, #tpu.memory_space<vmem>>, vector<1x288x4xbf16>
    %2 = vector.shape_cast %1 : vector<1x288x4xbf16> to vector<288x4xbf16>
    %c0_2 = arith.constant 0 : index
    %c0_3 = arith.constant 0 : index
    %c0_4 = arith.constant 0 : index
    %3 = vector.load %arg2[%c0_2, %c0_3, %c0_4] : memref<9x4x128xbf16, #tpu.memory_space<vmem>>, vector<1x4x128xbf16>
    %4 = vector.shape_cast %3 : vector<1x4x128xbf16> to vector<4x128xbf16>
    %cst_5 = arith.constant dense<0.000000e+00> : vector<288x128xf32>
    %5 = tpu.matmul %2, %4, %cst_5 {dimension_numbers = #tpu.dot_dimension_numbers<[1], [0], [0], [1], [0, 0, 1, 1], [], []>} : vector<288x4xbf16>, vector<4x128xbf16>, vector<288x128xf32> -> vector<288x128xf32>
    %6 = arith.addf %0, %5 : vector<288x128xf32>
    %c0_6 = arith.constant 0 : index
    %c1 = arith.constant 1 : index
    %c0_7 = arith.constant 0 : index
    %7 = vector.load %arg1[%c0_6, %c1, %c0_7] : memref<1x342x4xbf16, #tpu.memory_space<vmem>>, vector<1x288x4xbf16>
    %8 = vector.shape_cast %7 : vector<1x288x4xbf16> to vector<288x4xbf16>
    %c1_8 = arith.constant 1 : index
    %c0_9 = arith.constant 0 : index
    %c0_10 = arith.constant 0 : index
    %9 = vector.load %arg2[%c1_8, %c0_9, %c0_10] : memref<9x4x128xbf16, #tpu.memory_space<vmem>>, vector<1x4x128xbf16>
    %10 = vector.shape_cast %9 : vector<1x4x128xbf16> to vector<4x128xbf16>
    %cst_11 = arith.constant dense<0.000000e+00> : vector<288x128xf32>
    %11 = tpu.matmul %8, %10, %cst_11 {dimension_numbers = #tpu.dot_dimension_numbers<[1], [0], [0], [1], [0, 0, 1, 1], [], []>} : vector<288x4xbf16>, vector<4x128xbf16>, vector<288x128xf32> -> vector<288x128xf32>
    %12 = arith.addf %6, %11 : vector<288x128xf32>
    %c0_12 = arith.constant 0 : index
    %c2 = arith.constant 2 : index
    %c0_13 = arith.constant 0 : index
    %13 = vector.load %arg1[%c0_12, %c2, %c0_13] : memref<1x342x4xbf16, #tpu.memory_space<vmem>>, vector<1x288x4xbf16>
    %14 = vector.shape_cast %13 : vector<1x288x4xbf16> to vector<288x4xbf16>
    %c2_14 = arith.constant 2 : index
    %c0_15 = arith.constant 0 : index
    %c0_16 = arith.constant 0 : index
    %15 = vector.load %arg2[%c2_14, %c0_15, %c0_16] : memref<9x4x128xbf16, #tpu.memory_space<vmem>>, vector<1x4x128xbf16>
    %16 = vector.shape_cast %15 : vector<1x4x128xbf16> to vector<4x128xbf16>
    %cst_17 = arith.constant dense<0.000000e+00> : vector<288x128xf32>
    %17 = tpu.matmul %14, %16, %cst_17 {dimension_numbers = #tpu.dot_dimension_numbers<[1], [0], [0], [1], [0, 0, 1, 1], [], []>} : vector<288x4xbf16>, vector<4x128xbf16>, vector<288x128xf32> -> vector<288x128xf32>
    %18 = arith.addf %12, %17 : vector<288x128xf32>
    %c0_18 = arith.constant 0 : index
    %c18 = arith.constant 18 : index
    %c0_19 = arith.constant 0 : index
    %19 = vector.load %arg1[%c0_18, %c18, %c0_19] : memref<1x342x4xbf16, #tpu.memory_space<vmem>>, vector<1x288x4xbf16>
    %20 = vector.shape_cast %19 : vector<1x288x4xbf16> to vector<288x4xbf16>
    %c3 = arith.constant 3 : index
    %c0_20 = arith.constant 0 : index
    %c0_21 = arith.constant 0 : index
    %21 = vector.load %arg2[%c3, %c0_20, %c0_21] : memref<9x4x128xbf16, #tpu.memory_space<vmem>>, vector<1x4x128xbf16>
    %22 = vector.shape_cast %21 : vector<1x4x128xbf16> to vector<4x128xbf16>
    %cst_22 = arith.constant dense<0.000000e+00> : vector<288x128xf32>
    %23 = tpu.matmul %20, %22, %cst_22 {dimension_numbers = #tpu.dot_dimension_numbers<[1], [0], [0], [1], [0, 0, 1, 1], [], []>} : vector<288x4xbf16>, vector<4x128xbf16>, vector<288x128xf32> -> vector<288x128xf32>
    %24 = arith.addf %18, %23 : vector<288x128xf32>
    %c0_23 = arith.constant 0 : index
    %c19 = arith.constant 19 : index
    %c0_24 = arith.constant 0 : index
    %25 = vector.load %arg1[%c0_23, %c19, %c0_24] : memref<1x342x4xbf16, #tpu.memory_space<vmem>>, vector<1x288x4xbf16>
    %26 = vector.shape_cast %25 : vector<1x288x4xbf16> to vector<288x4xbf16>
    %c4 = arith.constant 4 : index
    %c0_25 = arith.constant 0 : index
    %c0_26 = arith.constant 0 : index
    %27 = vector.load %arg2[%c4, %c0_25, %c0_26] : memref<9x4x128xbf16, #tpu.memory_space<vmem>>, vector<1x4x128xbf16>
    %28 = vector.shape_cast %27 : vector<1x4x128xbf16> to vector<4x128xbf16>
    %cst_27 = arith.constant dense<0.000000e+00> : vector<288x128xf32>
    %29 = tpu.matmul %26, %28, %cst_27 {dimension_numbers = #tpu.dot_dimension_numbers<[1], [0], [0], [1], [0, 0, 1, 1], [], []>} : vector<288x4xbf16>, vector<4x128xbf16>, vector<288x128xf32> -> vector<288x128xf32>
    %30 = arith.addf %24, %29 : vector<288x128xf32>
    %c0_28 = arith.constant 0 : index
    %c20 = arith.constant 20 : index
    %c0_29 = arith.constant 0 : index
    %31 = vector.load %arg1[%c0_28, %c20, %c0_29] : memref<1x342x4xbf16, #tpu.memory_space<vmem>>, vector<1x288x4xbf16>
    %32 = vector.shape_cast %31 : vector<1x288x4xbf16> to vector<288x4xbf16>
    %c5 = arith.constant 5 : index
    %c0_30 = arith.constant 0 : index
    %c0_31 = arith.constant 0 : index
    %33 = vector.load %arg2[%c5, %c0_30, %c0_31] : memref<9x4x128xbf16, #tpu.memory_space<vmem>>, vector<1x4x128xbf16>
    %34 = vector.shape_cast %33 : vector<1x4x128xbf16> to vector<4x128xbf16>
    %cst_32 = arith.constant dense<0.000000e+00> : vector<288x128xf32>
    %35 = tpu.matmul %32, %34, %cst_32 {dimension_numbers = #tpu.dot_dimension_numbers<[1], [0], [0], [1], [0, 0, 1, 1], [], []>} : vector<288x4xbf16>, vector<4x128xbf16>, vector<288x128xf32> -> vector<288x128xf32>
    %36 = arith.addf %30, %35 : vector<288x128xf32>
    %c0_33 = arith.constant 0 : index
    %c36 = arith.constant 36 : index
    %c0_34 = arith.constant 0 : index
    %37 = vector.load %arg1[%c0_33, %c36, %c0_34] : memref<1x342x4xbf16, #tpu.memory_space<vmem>>, vector<1x288x4xbf16>
    %38 = vector.shape_cast %37 : vector<1x288x4xbf16> to vector<288x4xbf16>
    %c6 = arith.constant 6 : index
    %c0_35 = arith.constant 0 : index
    %c0_36 = arith.constant 0 : index
    %39 = vector.load %arg2[%c6, %c0_35, %c0_36] : memref<9x4x128xbf16, #tpu.memory_space<vmem>>, vector<1x4x128xbf16>
    %40 = vector.shape_cast %39 : vector<1x4x128xbf16> to vector<4x128xbf16>
    %cst_37 = arith.constant dense<0.000000e+00> : vector<288x128xf32>
    %41 = tpu.matmul %38, %40, %cst_37 {dimension_numbers = #tpu.dot_dimension_numbers<[1], [0], [0], [1], [0, 0, 1, 1], [], []>} : vector<288x4xbf16>, vector<4x128xbf16>, vector<288x128xf32> -> vector<288x128xf32>
    %42 = arith.addf %36, %41 : vector<288x128xf32>
    %c0_38 = arith.constant 0 : index
    %c37 = arith.constant 37 : index
    %c0_39 = arith.constant 0 : index
    %43 = vector.load %arg1[%c0_38, %c37, %c0_39] : memref<1x342x4xbf16, #tpu.memory_space<vmem>>, vector<1x288x4xbf16>
    %44 = vector.shape_cast %43 : vector<1x288x4xbf16> to vector<288x4xbf16>
    %c7 = arith.constant 7 : index
    %c0_40 = arith.constant 0 : index
    %c0_41 = arith.constant 0 : index
    %45 = vector.load %arg2[%c7, %c0_40, %c0_41] : memref<9x4x128xbf16, #tpu.memory_space<vmem>>, vector<1x4x128xbf16>
    %46 = vector.shape_cast %45 : vector<1x4x128xbf16> to vector<4x128xbf16>
    %cst_42 = arith.constant dense<0.000000e+00> : vector<288x128xf32>
    %47 = tpu.matmul %44, %46, %cst_42 {dimension_numbers = #tpu.dot_dimension_numbers<[1], [0], [0], [1], [0, 0, 1, 1], [], []>} : vector<288x4xbf16>, vector<4x128xbf16>, vector<288x128xf32> -> vector<288x128xf32>
    %48 = arith.addf %42, %47 : vector<288x128xf32>
    %c0_43 = arith.constant 0 : index
    %c38 = arith.constant 38 : index
    %c0_44 = arith.constant 0 : index
    %49 = vector.load %arg1[%c0_43, %c38, %c0_44] : memref<1x342x4xbf16, #tpu.memory_space<vmem>>, vector<1x288x4xbf16>
    %50 = vector.shape_cast %49 : vector<1x288x4xbf16> to vector<288x4xbf16>
    %c8 = arith.constant 8 : index
    %c0_45 = arith.constant 0 : index
    %c0_46 = arith.constant 0 : index
    %51 = vector.load %arg2[%c8, %c0_45, %c0_46] : memref<9x4x128xbf16, #tpu.memory_space<vmem>>, vector<1x4x128xbf16>
    %52 = vector.shape_cast %51 : vector<1x4x128xbf16> to vector<4x128xbf16>
    %cst_47 = arith.constant dense<0.000000e+00> : vector<288x128xf32>
    %53 = tpu.matmul %50, %52, %cst_47 {dimension_numbers = #tpu.dot_dimension_numbers<[1], [0], [0], [1], [0, 0, 1, 1], [], []>} : vector<288x4xbf16>, vector<4x128xbf16>, vector<288x128xf32> -> vector<288x128xf32>
    %54 = arith.addf %48, %53 : vector<288x128xf32>
    %c0_48 = arith.constant 0 : index
    %c0_49 = arith.constant 0 : index
    %55 = vector.load %arg3[%c0_48, %c0_49] : memref<1x128xf32, #tpu.memory_space<vmem>>, vector<1x128xf32>
    %56 = vector.broadcast %55 : vector<1x128xf32> to vector<288x128xf32>
    %57 = arith.addf %54, %56 : vector<288x128xf32>
    %cst_50 = arith.constant 0.000000e+00 : f32
    %58 = vector.broadcast %cst_50 : f32 to vector<288x128xf32>
    %59 = arith.maximumf %57, %58 : vector<288x128xf32>
    %60 = arith.truncf %59 : vector<288x128xf32> to vector<288x128xbf16>
    %c0_51 = arith.constant 0 : index
    %c0_52 = arith.constant 0 : index
    %c0_53 = arith.constant 0 : index
    %61 = vector.load %arg4[%c0_51, %c0_52, %c0_53] : memref<1x288x128xbf16, #tpu.memory_space<vmem>>, vector<1x288x128xbf16>
    %62 = vector.shape_cast %61 : vector<1x288x128xbf16> to vector<288x128xbf16>
    %63 = vector.shape_cast %60 : vector<288x128xbf16> to vector<1x288x128xbf16>
    tpu.vector_store %arg4[%c0_51, %c0_52, %c0_53], %63 {strides = array<i32>} : memref<1x288x128xbf16, #tpu.memory_space<vmem>>, vector<1x288x128xbf16>,
    return
  }
  func.func @transform_0(%arg0: i32) -> (i32, i32, i32) {
    %c0_i32 = arith.constant 0 : i32
    %c0_i32_0 = arith.constant 0 : i32
    %c0_i32_1 = arith.constant 0 : i32
    return %arg0, %c0_i32, %c0_i32_0 : i32, i32, i32
  }
  func.func @transform_1(%arg0: i32) -> (i32, i32, i32) {
    %c0_i32 = arith.constant 0 : i32
    %c0_i32_0 = arith.constant 0 : i32
    %c0_i32_1 = arith.constant 0 : i32
    %c0_i32_2 = arith.constant 0 : i32
    return %c0_i32, %c0_i32_0, %c0_i32_1 : i32, i32, i32
  }
  func.func @transform_2(%arg0: i32) -> (i32, i32) {
    %c0_i32 = arith.constant 0 : i32
    %c0_i32_0 = arith.constant 0 : i32
    %c0_i32_1 = arith.constant 0 : i32
    return %c0_i32, %c0_i32_0 : i32, i32
  }
  func.func @transform_3(%arg0: i32) -> (i32, i32, i32) {
    %c0_i32 = arith.constant 0 : i32
    %c0_i32_0 = arith.constant 0 : i32
    %c0_i32_1 = arith.constant 0 : i32
    return %arg0, %c0_i32, %c0_i32_0 : i32, i32, i32
  }
}

</mosaic_0001>

<bundles_post_ra>
// kernel: tpu_custom_call.1
= control target key start
LH: loop header
LB: loop body
LE: loop exit
PB: predicated region body
PF: predicated region fallthrough
CT: control target
= control target key end

     0   :  { %8 = vsyncpa [#allocation3], 0  ;;  %s6383_s0 = inlined_call_operand.vmem [shape: bf16[2,342,4], index: 0, kind: input, shape index: {}]   ;;  %s6384_s1 = inlined_call_operand.vmem [shape: bf16[9,4,128], index: 1, kind: input, shape index: {}]   ;;  %s6385_s2 = inlined_call_operand.vmem [shape: f32[1,128], index: 2, kind: input, shape index: {}]   ;;  %s6386_s3 = inlined_call_operand.hbm [shape: bf16[2,288,128], index: 3, kind: output, shape index: {}]  }
   0x1   :  { %10 = vsyncpa [#allocation3 + $0x1], 0  ;;  %s5390_s12 = smov 0   ;;  %s5392_s13 = smov 0  }
   0x2   :  { %s5394_s14 = smov 0   ;;  %s5396_s15 = smov 0  }
   0x3 LB: > { %s5411_s16 = sadd.s32 4294967295, %s5365_s15   ;;  %s3953_s17 = sadd.s32 4294967294, %s5365_s15   ;;  %s5365_s15 = sphi %s5396_s15, %s6392_s15   ;;  %s5361_s14 = sphi %s5394_s14, %s6391_s14   ;;  %s5357_s13 = sphi %s5392_s13, %s6390_s13   ;;  %s5353_s12 = sphi %s5390_s12, %s6389_s12  }
   0x4   : > { %s5415_s18 = sadd.s32 1, %s5365_s15   ;;  %s91_s19 = sadd.s32 1, %s5361_s14 }
   0x5   : > { %s88_s20 = ssub.s32 %s5365_s15, %s5415_s18  ;;  %p101_p0 = scmp.ne.s32.totalorder %s5361_s14, %s5357_s13 }
   0x6   : > { %p89_p1 = scmp.eq.s32.totalorder %s88_s20, 0  ;;  %p102_p2 = scmp.eq.s32.totalorder %s5411_s16, 1 }
   0x7   : > { %p107_p3 = scmp.ne.s32.totalorder %s5357_s13, %s5353_s12  ;;  %p108_p4 = scmp.eq.s32.totalorder %s3953_s17, 1 }
   0x8   : > { %s5426_s21 = scalar_select %p89_p1, %s5361_s14, %s91_s19  }
   0x9   : > { %p5428_p5 = por %p102_p2, %p101_p0  ;;  %p5432_p6 = por %p108_p4, %p107_p3 }
   0xa   : > { %p3956_p7 = scmp.ge.s32.totalorder %s5365_s15, 1  ;;  %p140_p8 = scmp.lt.s32.totalorder %s5365_s15, 3 }
   0xc   : > { %p141_p9 = pnand %p3956_p7, %p140_p8 }
   0xd   : > { %vm507_vm0 = vcmask (!%p141_p9), 1041408   ;;  %v4072_v0 = vld [vmem:[%s6384_s1 + $0x8] sm:$0x3] (!%p141_p9)  ;;  %v3958_v1 = vld [vmem:[%s6384_s1 + $0x2] sm:$0x3] (!%p141_p9)  ;;  %p164_p10 = scmp.lt.s32.totalorder (!%p141_p9), %s5411_s16, 1 }
   0xe   : > { %144 = sbr.rel (%p141_p9) target bundleno = 598 (0x256), region = 32  ;;  %5180 = vmatprep.subr.msk.bf16.mxu0 (!%p141_p9), %vm507_vm0, %v4072_v0  ;;  %5176 = vmatprep.subr.msk.bf16.mxu1 (!%p141_p9), %vm507_vm0, %v3958_v1  ;;  %v5448_v2 = vsel (!%p141_p9), %vm507_vm0, %v4072_v0, 0  ;;  %v509_v3 = vsel (!%p141_p9), %vm507_vm0, %v3958_v1, 0  ;;  %v4092_v4 = vld [vmem:[%s6384_s1 + $0xa] sm:$0x3] (!%p141_p9)  ;;  %vm452_vm2 = vcmask (!%p141_p9), 31744  }
   0xf   : > { %4697 = vmatpush3.bf16.msra.mxu0 (!%p141_p9), %v5448_v2  ;;  %4545 = vmatpush3.bf16.msra.mxu1 (!%p141_p9), %v509_v3  ;;  %v206_v5 = vld [vmem:[%s6384_s1] sm:$0x3] (!%p141_p9)  ;;  %vm303_vm1 = vsmask.f32 (!%p141_p9), 7424  ;;  %v5467_v6 = vsel (!%p141_p9), %vm507_vm0, %v4092_v4, 0  ;;  %vm2110_vm4 = vcmask (!%p141_p9), 1045504  }
  0x10   : > { %5182 = vmatprep.subr.msk.bf16.mxu0 (!%p141_p9), %vm507_vm0, %v4092_v4  ;;  %5177 = vmatprep.subr.msk.bf16.mxu1 (!%p141_p9), %vm507_vm0, %v206_v5  ;;  %vm1663_vm3 = vsmask.f32 (!%p141_p9), 6400  ;;  %v725_v12 = vsel (!%p141_p9), %vm507_vm0, %v206_v5, 0  ;;  %v5515_v39 = vld [vmem:[%s6384_s1 + $0x4] sm:$0x3] (!%p141_p9)  ;;  %vm910_vm5 = vcmask (!%p141_p9), 1046528  }
  0x11   : > { %v5549_v1 = vld [vmem:[%s6384_s1 + $0xc] sm:$0x3] (!%p141_p9)  ;;  %vm2863_vm6 = vsmask.f32 (!%p141_p9), 5376  ;;  %vm3310_vm7 = vcmask (!%p141_p9), 1044480   ;;  %s5367_s24 = smov (!%p141_p9), [#allocation2]  }
  0x12   : > { %s5307_s25 = sshll.u32 (!%p141_p9), %s5367_s24, 4  ;;  %s5308_s25 = int_to_ptr.vmem [resolvable:$false] %s5307_s25 }
  0x13   : > { %s5309_s26 = scalar_lea.vmem (!%p141_p9), %s5308_s25, 4608 }
  0x15   : > { %s165_s28 = scalar_select %p164_p10, %s5411_s16, 1 }
  0x17   : > { %s5187_s6 = smul.u32 172, %s165_s28 }
  0x19   : > { %s5464_s9 = scalar_lea.vmem %s6383_s0, %s5187_s6  ;;  %s161_s6 = sand.u32 1, %s5357_s13  }
  0x1a   : > { %v170_v7 = vld [vmem:[%s5464_s9] sm:$0xf]  ;;  %v5471_v8 = vld [vmem:[%s5464_s9 + $0x4] sm:$0xf]  ;;  %v5477_v10 = vld [vmem:[%s5464_s9 + $0x8] sm:$0xff]   ;;  %s5186_s7 = smul.u32 144, %s161_s6 }
  0x1b   : > { %v5474_v9 = vcombine.low %v170_v7, %v5471_v8  ;;  %v1218_v11 = vld [vmem:[%s5464_s9 + $0x8] sm:$0xe]  ;;  %v5482_v13 = vld [vmem:[%s5464_s9 + $0xc] sm:$0xf]  ;;  %v312_v16 = vshll.u32 %v5477_v10, 16  ;;  %v316_v17 = vshrl.u32 %v5477_v10, 16 }
  0x1c   : > { %v5489_v18 = vld [vmem:[%s5464_s9 + $0x10] sm:$0xff]   ;;  %v5495_v20 = vcombine.low %v1218_v11, %v5482_v13  ;;  %v5503_v28 = vld [vmem:[%s5464_s9 + $0x18] sm:$0xff]   ;;  %v5509_v34 = vld [vmem:[%s5464_s9 + $0x20] sm:$0xff]   ;;  %s6271_s8 = scalar_lea.vmem [#allocation2], %s5186_s7 }
  0x1d   : > { %v305_v14 = vshrl.u32 %v5474_v9, 16  ;;  %v307_v15 = vshll.u32 %v5474_v9, 16  ;;  %v5492_v19 = vld [vmem:[%s5464_s9 + $0x10] sm:$0xff]   ;;  %v314_v22 = vrot.slane %v312_v16, 1  ;;  %v1673_v23 = vshrl.u32 %v5489_v18, 16  ;;  %v5506_v33 = vld [vmem:[%s5464_s9 + $0x18] sm:$0xff]  }
  0x1e   : > { %v1676_v24 = vshll.u32 %v5489_v18, 16  ;;  %v1665_v25 = vshrl.u32 %v5495_v20, 16  ;;  %v1668_v26 = vshll.u32 %v5495_v20, 16  ;;  %v320_v27 = vshll.u32 %v5492_v19, 16  ;;  %v5524_v48 = vld [vmem:[%s5464_s9 + $0x20] sm:$0xff]   ;;  %v5527_v49 = vld [vmem:[%s5464_s9 + $0x28] sm:$0xff]  }
  0x1f   : > { %v309_v21 = vrot.slane %v307_v15, 1  ;;  %v318_v30 = vor.u32 %v316_v17, %v314_v22  ;;  %v1675_v31 = vrot.slane %v1673_v23, 1  ;;  %v1682_v38 = vshrl.u32 %v5503_v28, 16  ;;  %v5533_v54 = vld [vmem:[%s5464_s9 + $0x28] sm:$0xff]   ;;  %v5539_v59 = vld [vmem:[%s5464_s9 + $0x30] sm:$0xff]   ;;  %v5563_v23 = vld [vmem:[%s5464_s9 + $0x38] sm:$0xff]  }
  0x20   : > { %v1678_v32 = vrot.slane %v1676_v24, 2  ;;  %v1667_v35 = vrot.slane %v1665_v25, 1  ;;  %v1670_v36 = vrot.slane %v1668_v26, 2  ;;  %v322_v37 = vrot.slane %v320_v27, 1  ;;  %v5544_v0 = vld [vmem:[%s5464_s9 + $0x30] sm:$0xff]   ;;  %s3891_s10 = sshll.u32 %s6271_s8, 4  ;;  %s6336_s10 = int_to_ptr.vmem [resolvable:$true] %s3891_s10 }
  0x21   : > { %v310_v29 = vor.u32 %v309_v21, %v305_v14  ;;  %v1685_v42 = vshll.u32 %v5503_v28, 16  ;;  %v324_v43 = vshrl.u32 %v5492_v19, 16  ;;  %v1684_v46 = vrot.slane %v1682_v38, 1  ;;  %s5303_s20 = scalar_lea.vmem %s6336_s10, 2304  ;;  %p5310_p0 = scmp.lt.s32.totalorder %s6336_s10, %s5308_s25 }
  0x22   : > { %v1679_v41 = vor.u32 %v1678_v32, %v1675_v31  ;;  %v1671_v44 = vor.u32 %v1670_v36, %v1667_v35  ;;  %v323_v45 = vsel %vm303_vm1, %v318_v30, %v322_v37  ;;  %v328_v47 = vshll.u32 %v5506_v33, 16  ;;  %v5572_v35 = vld [vmem:[%s5464_s9 + $0x38] sm:$0xff]   ;;  %p5304_p11 = scmp.ne.s32.totalorder %s6336_s10, %s5303_s20  ;;  %p5311_p1 = scmp.lt.s32.totalorder %s5309_s26, %s5303_s20 }
  0x23   : > { %v315_v40 = vsel %vm303_vm1, %v310_v29, %v314_v22  ;;  %v1687_v50 = vrot.slane %v1685_v42, 2  ;;  %v326_v51 = vor.u32 %v324_v43, %v322_v37  ;;  %v1691_v52 = vshrl.u32 %v5509_v34, 16 }
  0x24   : > { %4546 = vmatprep.mubr.msk.bf16.mxu1 %vm452_vm2, %v315_v40  ;;  %v1694_v53 = vshll.u32 %v5509_v34, 16  ;;  %v1680_v55 = vsel %vm1663_vm3, %v1671_v44, %v1679_v41  ;;  %v330_v56 = vrot.slane %v328_v47, 1  ;;  %v332_v57 = vshrl.u32 %v5506_v33, 16  ;;  %v5583_v44 = vld [vmem:[%s5464_s9 + $0x40] sm:$0xff]   ;;  %p5305_p12 = pnand %p5304_p11, %p5428_p5  ;;  %p5312_p2 = por %p5311_p1, %p5310_p0 }
  0x25   : > { %4547 = vmatmul.mubr.msk.bf16.vlgmr.msra.gmra.mrb[0].mxu1 %vm452_vm2, %v323_v45  ;;  %v336_v58 = vshll.u32 %v5524_v48, 16  ;;  %4698 = vmatprep.mubr.msk.bf16.mxu0 %vm452_vm2, %v1680_v55  ;;  %v1688_v60 = vor.u32 %v1687_v50, %v1684_v46  ;;  %v1693_v61 = vrot.slane %v1691_v52, 1  ;;  %v1700_v63 = vshrl.u32 %v5527_v49, 16 }
  0x26   : > { %4583 = vmatpush3.bf16.msra.mxu1 %v725_v12  ;;  %v1696_v62 = vrot.slane %v1694_v53, 2  ;;  %v331_v3 = vsel %vm303_vm1, %v326_v51, %v330_v56  ;;  %v334_v4 = vor.u32 %v332_v57, %v330_v56  ;;  %v1703_v7 = vshll.u32 %v5527_v49, 16  ;;  %v5588_v51 = vld [vmem:[%s5464_s9 + $0x40] sm:$0xff]   ;;  %p5306_p13 = pneg %p5305_p12 }
  0x27   : > { %5178 = vmatprep.subr.msk.bf16.mxu1 %vm507_vm0, %v5515_v39  ;;  %v338_v5 = vrot.slane %v336_v58, 1  ;;  %v1689_v11 = vsel %vm1663_vm3, %v1679_v41, %v1688_v60  ;;  %4550 = vmatprep.mubr.msk.bf16.mxu1 %vm452_vm2, %v331_v3  ;;  %v1702_v14 = vrot.slane %v1700_v63, 1  ;;  %v340_v15 = vshrl.u32 %v5524_v48, 16  ;;  %v5599_v63 = vld [vmem:[%s5464_s9 + $0x48] sm:$0xff]  }
  0x28   : > { %v1697_v12 = vor.u32 %v1696_v62, %v1693_v61  ;;  %4699 = vmatmul.mubr.msk.bf16.vlgmr.msra.gmra.mrb[0].mxu0 %vm452_vm2, %v1689_v11  ;;  %v1705_v17 = vrot.slane %v1703_v7, 2  ;;  %v344_v21 = vshll.u32 %v5533_v54, 16  ;;  %v1709_v22 = vshrl.u32 %v5539_v59, 16  ;;  %v5596_v62 = vld [vmem:[%s5464_s9 + $0x48] sm:$0xff]   ;;  %p5313_p3 = pnand %p5312_p2, %p5306_p13 }
  0x29   : > { %v339_v16 = vsel %vm303_vm1, %v334_v4, %v338_v5  ;;  %4735 = vmatpush3.bf16.msra.mxu0 %v5467_v6  ;;  %v342_v25 = vor.u32 %v340_v15, %v338_v5  ;;  %v1712_v26 = vshll.u32 %v5539_v59, 16  ;;  %v348_v27 = vshrl.u32 %v5533_v54, 16 }
  0x2a   : > { %v1698_v24 = vsel %vm1663_vm3, %v1688_v60, %v1697_v12  ;;  %v1706_v29 = vor.u32 %v1705_v17, %v1702_v14  ;;  %v346_v30 = vrot.slane %v344_v21, 1  ;;  %v1711_v31 = vrot.slane %v1709_v22, 1  ;;  %5183 = vmatprep.subr.msk.bf16.mxu0 %vm507_vm0, %v5549_v1  ;;  %v5608_v14 = vld [vmem:[%s5464_s9 + $0x50] sm:$0xff]  }
  0x2b   : > { %4702 = vmatprep.mubr.msk.bf16.mxu0 %vm452_vm2, %v1698_v24  ;;  %v352_v32 = vshll.u32 %v5544_v0, 16  ;;  %v1714_v6 = vrot.slane %v1712_v26, 2  ;;  %v1718_v36 = vshrl.u32 %v5563_v23, 16  ;;  %v1721_v37 = vshll.u32 %v5563_v23, 16 }
  0x2c   : > { %v356_v38 = vshrl.u32 %v5544_v0, 16  ;;  %v1707_v40 = vsel %vm1663_vm3, %v1697_v12, %v1706_v29  ;;  %v347_v41 = vsel %vm303_vm1, %v342_v25, %v346_v30  ;;  %v350_v42 = vor.u32 %v348_v27, %v346_v30  ;;  %v5616_v25 = vld [vmem:[%s5464_s9 + $0x50] sm:$0xff]  }
  0x2d   : > { %4551 = vmatmul.mubr.msk.bf16.gmra.mrb[4].mxu1 %vm452_vm2, %v339_v16  ;;  %v354_v43 = vrot.slane %v352_v32, 1  ;;  %v1715_v45 = vor.u32 %v1714_v6, %v1711_v31  ;;  %v1720_v46 = vrot.slane %v1718_v36, 1  ;;  %v1723_v47 = vrot.slane %v1721_v37, 2 }
  0x2e   : > { %4554 = vmatprep.mubr.msk.bf16.mxu1 %vm452_vm2, %v347_v41  ;;  %v360_v50 = vshll.u32 %v5572_v35, 16  ;;  %v1727_v55 = vshrl.u32 %v5583_v44, 16  ;;  %v1730_v56 = vshll.u32 %v5583_v44, 16  ;;  %v364_v61 = vshrl.u32 %v5572_v35, 16  ;;  %v5626_v41 = vld [vmem:[%s5464_s9 + $0x58] sm:$0xff]  }
  0x2f   : > { %v355_v52 = vsel %vm303_vm1, %v350_v42, %v354_v43  ;;  %v358_v53 = vor.u32 %v356_v38, %v354_v43  ;;  %v1716_v57 = vsel %vm1663_vm3, %v1706_v29, %v1715_v45  ;;  %v1724_v58 = vor.u32 %v1723_v47, %v1720_v46  ;;  %v5621_v29 = vld [vmem:[%s5464_s9 + $0x58] sm:$0xff]  }
  0x30   : > { %v362_v60 = vrot.slane %v360_v50, 1  ;;  %4703 = vmatmul.mubr.msk.bf16.gmra.mrb[4].mxu0 %vm452_vm2, %v1707_v40  ;;  %v1729_v3 = vrot.slane %v1727_v55, 1  ;;  %v1732_v4 = vrot.slane %v1730_v56, 2  ;;  %v368_v5 = vshll.u32 %v5588_v51, 16 }
  0x31   : > { %v372_v7 = vshrl.u32 %v5588_v51, 16  ;;  %4706 = vmatprep.mubr.msk.bf16.mxu0 %vm452_vm2, %v1716_v57  ;;  %v1736_v12 = vshrl.u32 %v5596_v62, 16  ;;  %v1739_v16 = vshll.u32 %v5596_v62, 16  ;;  %v376_v17 = vshll.u32 %v5599_v63, 16  ;;  %v2104_v57 = vld [vmem:[%s5464_s9 + $0x8] sm:$0xc] }
  0x32   : > { %v363_v11 = vsel %vm303_vm1, %v358_v53, %v362_v60  ;;  %v1733_v15 = vor.u32 %v1732_v4, %v1729_v3  ;;  %v370_v21 = vrot.slane %v368_v5, 1  ;;  %v1745_v22 = vshrl.u32 %v5608_v14, 16 }
  0x33   : > { %v1748_v24 = vshll.u32 %v5608_v14, 16  ;;  %v1725_v26 = vsel %vm1663_vm3, %v1715_v45, %v1724_v58  ;;  %v366_v27 = vor.u32 %v364_v61, %v362_v60  ;;  %v1738_v30 = vrot.slane %v1736_v12, 1 }
  0x34   : > { %v1741_v31 = vrot.slane %v1739_v16, 2  ;;  %v374_v32 = vor.u32 %v372_v7, %v370_v21  ;;  %v378_v6 = vrot.slane %v376_v17, 1  ;;  %v1734_v36 = vsel %vm1663_vm3, %v1724_v58, %v1733_v15  ;;  %v5640_v58 = vld [vmem:[%s5464_s9 + $0x60] sm:$0xff]  }
  0x35   : > { %4555 = vmatmul.mubr.msk.bf16.gmra.mrb[8].mxu1 %vm452_vm2, %v355_v52  ;;  %v1747_v37 = vrot.slane %v1745_v22, 1  ;;  %v1750_v38 = vrot.slane %v1748_v24, 2  ;;  %v384_v40 = vshll.u32 %v5616_v25, 16  ;;  %v371_v42 = vsel %vm303_vm1, %v366_v27, %v370_v21 }
  0x36   : > { %4558 = vmatprep.mubr.msk.bf16.mxu1 %vm452_vm2, %v363_v11  ;;  %v380_v43 = vshrl.u32 %v5599_v63, 16  ;;  %v1754_v45 = vshrl.u32 %v5621_v29, 16  ;;  %v1757_v46 = vshll.u32 %v5621_v29, 16  ;;  %v1742_v47 = vor.u32 %v1741_v31, %v1738_v30  ;;  %v5645_v11 = vld [vmem:[%s5464_s9 + $0x68] sm:$0xff]  }
  0x37   : > { %v379_v50 = vsel %vm303_vm1, %v374_v32, %v378_v6  ;;  %v388_v52 = vshrl.u32 %v5616_v25, 16  ;;  %v392_v53 = vshll.u32 %v5626_v41, 16  ;;  %v1751_v55 = vor.u32 %v1750_v38, %v1747_v37  ;;  %v5662_v32 = vld [vmem:[%s5464_s9 + $0x70] sm:$0xff]  }
  0x38   : > { %4707 = vmatmul.mubr.msk.bf16.gmra.mrb[8].mxu0 %vm452_vm2, %v1725_v26  ;;  %v386_v56 = vrot.slane %v384_v40, 1  ;;  %v382_v60 = vor.u32 %v380_v43, %v378_v6  ;;  %v1756_v61 = vrot.slane %v1754_v45, 1  ;;  %v1759_v3 = vrot.slane %v1757_v46, 2  ;;  %v5668_v40 = vld [vmem:[%s5464_s9 + $0x78] sm:$0xff]  }
  0x39   : > { %4710 = vmatprep.mubr.msk.bf16.mxu0 %vm452_vm2, %v1734_v36  ;;  %v1743_v4 = vsel %vm1663_vm3, %v1733_v15, %v1742_v47  ;;  %v394_v7 = vrot.slane %v392_v53, 1  ;;  %v1752_v12 = vsel %vm1663_vm3, %v1742_v47, %v1751_v55  ;;  %v4093_v16 = vcombine.low %v2104_v57, %v5482_v13 }
  0x3a   : > { %v390_v5 = vor.u32 %v388_v52, %v386_v56  ;;  %v400_v17 = vshll.u32 %v5640_v58, 16  ;;  %v387_v21 = vsel %vm303_vm1, %v382_v60, %v386_v56  ;;  %v396_v22 = vshrl.u32 %v5626_v41, 16  ;;  %v5683_v56 = vld [vmem:[%s5464_s9 + $0x80] sm:$0xff]  }
  0x3b   : > { %v5654_v15 = vor.u32 %v1759_v3, %v1756_v61  ;;  %v404_v26 = vshrl.u32 %v5640_v58, 16  ;;  %v408_v27 = vshll.u32 %v5645_v11, 16  ;;  %v2111_v13 = vrot.slane %v4093_v16, 2 }
  0x3c   : > { %v395_v24 = vsel %vm303_vm1, %v390_v5, %v394_v7  ;;  %v2112_v30 = vrot.slane %v5489_v18, 2  ;;  %v402_v31 = vrot.slane %v400_v17, 1  ;;  %v398_v6 = vor.u32 %v396_v22, %v394_v7 }
  0x3d   : > { %4559 = vmatmul.mubr.msk.bf16.gmra.mrb[12].mxu1 %vm452_vm2, %v371_v42  ;;  %v1761_v36 = vsel %vm1663_vm3, %v1751_v55, %v5654_v15  ;;  %v410_v38 = vrot.slane %v408_v27, 1  ;;  %v416_v18 = vshll.u32 %v5662_v32, 16  ;;  %v2114_v45 = vrot.slane %v5503_v28, 2  ;;  %v5713_v27 = vld [vmem:[%s5464_s9 + $0x90] ss:$0 sps:$4 sm:$0x11]  }
  0x3e   : > { %4562 = vmatprep.mubr.msk.bf16.mxu1 %vm452_vm2, %v379_v50  ;;  %v406_v37 = vor.u32 %v404_v26, %v402_v31  ;;  %v2113_v42 = vsel %vm2110_vm4, %v2111_v13, %v2112_v30  ;;  %v403_v43 = vsel %vm303_vm1, %v398_v6, %v402_v31  ;;  %v412_v46 = vshrl.u32 %v5645_v11, 16 }
  0x3f   : > { %v420_v50 = vshrl.u32 %v5662_v32, 16  ;;  %v424_v52 = vshll.u32 %v5668_v40, 16  ;;  %v2116_v53 = vrot.slane %v5509_v34, 2  ;;  %v418_v55 = vrot.slane %v416_v18, 1  ;;  %v5696_v34 = vld [vmem:[%s6384_s1 + $0xe] sm:$0x3] }
  0x40   : > { %4711 = vmatmul.mubr.msk.bf16.gmra.mrb[12].mxu0 %vm452_vm2, %v1743_v4  ;;  %v411_v47 = vsel %vm303_vm1, %v406_v37, %v410_v38  ;;  %v2642_v28 = vsel %vm507_vm0, %v5549_v1, 0  ;;  %v414_v57 = vor.u32 %v412_v46, %v410_v38  ;;  %v2115_v60 = vsel %vm2110_vm4, %v2112_v30, %v2114_v45  ;;  %v5690_v4 = vld [vmem:[%s5464_s9 + $0x88] sm:$0xff]  }
  0x41   : > { %4714 = vmatprep.mubr.msk.bf16.mxu0 %vm452_vm2, %v1752_v12  ;;  %v422_v61 = vor.u32 %v420_v50, %v418_v55  ;;  %v426_v3 = vrot.slane %v424_v52, 1  ;;  %v2117_v5 = vsel %vm2110_vm4, %v2114_v45, %v2116_v53  ;;  %v432_v7 = vshll.u32 %v5683_v56, 16 }
  0x42   : > { %v419_v1 = vsel %vm303_vm1, %v414_v57, %v418_v55  ;;  %v2118_v12 = vrot.slane %v5527_v49, 2  ;;  %v428_v16 = vshrl.u32 %v5668_v40, 16  ;;  %v440_v22 = vshll.u32 %v5690_v4, 16  ;;  %v5740_v55 = vld [vmem:[%s5464_s9 + $0x60] sm:$0xff]   ;;  %v5759_v57 = vld [vmem:[%s5464_s9 + $0x68] sm:$0xff]  }
  0x43   : > { %v427_v17 = vsel %vm303_vm1, %v422_v61, %v426_v3  ;;  %v434_v26 = vrot.slane %v432_v7, 1  ;;  %v448_v37 = vshll.u32 %v5713_v27, 16  ;;  %v2122_v38 = vrot.slane %v5563_v23, 2  ;;  %v5777_v7 = vld [vmem:[%s5464_s9 + $0x78] sm:$0xff]  }
  0x44   : > { %v430_v49 = vor.u32 %v428_v16, %v426_v3  ;;  %v2119_v13 = vsel %vm2110_vm4, %v2116_v53, %v2118_v12  ;;  %v442_v31 = vrot.slane %v440_v22, 1  ;;  %v2124_v18 = vrot.slane %v5583_v44, 2  ;;  %v5793_v22 = vld [vmem:[%s5464_s9 + $0x88] sm:$0xff]  }
  0x45   : > { %4563 = vmatmul.mubr.msk.bf16.gmra.mrb[16].mxu1 %vm452_vm2, %v387_v21  ;;  %v436_v21 = vshrl.u32 %v5683_v56, 16  ;;  %v450_v45 = vrot.slane %v448_v37, 1  ;;  %v2126_v23 = vrot.slane %v5596_v62, 2  ;;  %v2128_v44 = vrot.slane %v5608_v14, 2 }
  0x46   : > { %4566 = vmatprep.mubr.msk.bf16.mxu1 %vm452_vm2, %v395_v24  ;;  %v2120_v24 = vrot.slane %v5539_v59, 2  ;;  %v435_v59 = vsel %vm303_vm1, %v430_v49, %v434_v26  ;;  %v2130_v62 = vrot.slane %v5621_v29, 2  ;;  %v1003_v14 = vsel %vm507_vm0, %v5515_v39, 0 }
  0x47   : > { %v438_v30 = vor.u32 %v436_v21, %v434_v26  ;;  %v2127_v52 = vsel %vm2110_vm4, %v2124_v18, %v2126_v23  ;;  %v2129_v53 = vsel %vm2110_vm4, %v2126_v23, %v2128_v44  ;;  %v2134_v61 = vrot.slane %v5759_v57, 2  ;;  %v5797_v26 = vld [vmem:[%s5464_s9 + $0x90] sm:$0xff]  }
  0x48   : > { %4715 = vmatmul.mubr.msk.bf16.gmra.mrb[16].mxu0 %vm452_vm2, %v1761_v36  ;;  %v2121_v6 = vsel %vm2110_vm4, %v2118_v12, %v2120_v24  ;;  %v444_v36 = vshrl.u32 %v5690_v4, 16  ;;  %v2123_v46 = vsel %vm2110_vm4, %v2120_v24, %v2122_v38  ;;  %v2131_v29 = vsel %vm2110_vm4, %v2128_v44, %v2130_v62  ;;  %v5781_v12 = vld [vmem:[%s5464_s9 + $0x80] sm:$0xff]  }
  0x49   : > { %4736 = vmatprep.mubr.msk.bf16.mxu0 %vm452_vm2, %v2113_v42  ;;  %v443_v42 = vsel %vm303_vm1, %v438_v30, %v442_v31  ;;  %v2138_v16 = vrot.slane %v5777_v7, 2  ;;  %v2142_v49 = vrot.slane %v5793_v22, 2  ;;  %v2418_v30 = vld [vmem:[%s5464_s9 + $0x10] sm:$0xc] }
  0x4d   : > { %4567 = vmatmul.mubr.msk.bf16.gmra.mrb[20].mxu1 %vm452_vm2, %v403_v43  ;;  %v446_v43 = vor.u32 %v444_v36, %v442_v31  ;;  %v5807_v31 = vld [vmem:[%s5464_s9 + $0x14] sm:$0xf] }
  0x4e   : > { %4570 = vmatprep.mubr.msk.bf16.mxu1 %vm452_vm2, %v411_v47  ;;  %v2125_v47 = vsel %vm2110_vm4, %v2122_v38, %v2124_v18  ;;  %v5817_v37 = vcombine.low %v2418_v30, %v5807_v31  ;;  %v5820_v38 = vld [vmem:[%s5464_s9 + $0x18] sm:$0xff]  }
  0x4f   : > { %v451_v50 = vsel %vm303_vm1, %v446_v43, %v450_v45  ;;  %v2551_v43 = vrot.slane %v5820_v38, 2 }
  0x50   : > { %4737 = vmatmul.mubr.msk.bf16.vlgmr.msra.gmra.mrb[0].mxu0 %vm452_vm2, %v2115_v60  ;;  %v5765_v60 = vld [vmem:[%s5464_s9 + $0x70] sm:$0xff]   ;;  %v2550_v18 = vrot.slane %v5817_v37, 2 }
  0x51   : > { %4773 = vmatpush3.bf16.msra.mxu0 %v2642_v28  ;;  %4740 = vmatprep.mubr.msk.bf16.mxu0 %vm452_vm2, %v2117_v5  ;;  %v2132_v28 = vrot.slane %v5740_v55, 2  ;;  %v2136_v3 = vrot.slane %v5765_v60, 2 }
  0x52   : > { %5184 = vmatprep.subr.msk.bf16.mxu0 %vm507_vm0, %v5696_v34 }
  0x53   : > { %v2133_v39 = vsel %vm2110_vm4, %v2130_v62, %v2132_v28  ;;  %v2135_v5 = vsel %vm2110_vm4, %v2132_v28, %v2134_v61  ;;  %v2139_v21 = vsel %vm2110_vm4, %v2136_v3, %v2138_v16  ;;  %v3089_v62 = vsel %vm507_vm0, %v5696_v34, 0  ;;  %v5855_v28 = vld [vmem:[%s5464_s9 + $0x38] sm:$0xff]  }
  0x55   : > { %4571 = vmatmul.mubr.msk.bf16.gmra.mrb[24].mxu1 %vm452_vm2, %v419_v1  ;;  %v2137_v1 = vsel %vm2110_vm4, %v2134_v61, %v2136_v3  ;;  %v2559_v61 = vrot.slane %v5855_v28, 2  ;;  %v5874_v3 = vld [vmem:[%s5464_s9 + $0x40] sm:$0xff]  }
  0x56   : > { %4574 = vmatprep.mubr.msk.bf16.mxu1 %vm452_vm2, %v427_v17  ;;  %v2140_v17 = vrot.slane %v5781_v12, 2 }
  0x58   : > { %4741 = vmatmul.mubr.msk.bf16.gmra.mrb[4].mxu0 %vm452_vm2, %v2119_v13  ;;  %v2141_v24 = vsel %vm2110_vm4, %v2138_v16, %v2140_v17  ;;  %v2144_v13 = vrot.slane %v5797_v26, 2  ;;  %v904_v16 = vld [vmem:[%s5464_s9] sm:$0xe] }
  0x59   : > { %4744 = vmatprep.mubr.msk.bf16.mxu0 %vm452_vm2, %v2121_v6  ;;  %v2143_v6 = vsel %vm2110_vm4, %v2140_v17, %v2142_v49  ;;  %v2561_v17 = vrot.slane %v5874_v3, 2 }
  0x5a   : > { %v2145_v36 = vsel %vm2110_vm4, %v2142_v49, %v2144_v13 }
  0x5b   : > { %v2562_v49 = vsel %vm2110_vm4, %v2559_v61, %v2561_v17 }
  0x5d   : > { %4575 = vmatmul.mubr.msk.bf16.gmra.mrb[28].mxu1 %vm452_vm2, %v435_v59  ;;  %v5813_v59 = vld [vmem:[%s5464_s9 + $0x98] ss:$0 sps:$4 sm:$0x33]  }
  0x5e   : > { %4578 = vmatprep.mubr.msk.bf16.mxu1 %vm452_vm2, %v443_v42  ;;  %v2146_v42 = vrot.slane %v5813_v59, 2 }
  0x60   : > { %4745 = vmatmul.mubr.msk.bf16.gmra.mrb[8].mxu0 %vm452_vm2, %v2123_v46  ;;  %v2147_v45 = vsel %vm2110_vm4, %v2144_v13, %v2146_v42  ;;  %v5833_v46 = vld [vmem:[%s5464_s9 + $0x20] sm:$0xff]   ;;  %v5892_v13 = vld [vmem:[%s5464_s9 + $0x50] sm:$0xff]  }
  0x61   : > { %4748 = vmatprep.mubr.msk.bf16.mxu0 %vm452_vm2, %v2125_v47  ;;  %v2552_v47 = vsel %vm2110_vm4, %v2550_v18, %v2551_v43  ;;  %v2553_v23 = vrot.slane %v5833_v46, 2  ;;  %v2565_v42 = vrot.slane %v5892_v13, 2 }
  0x65   : > { %4579 = vmatmul.mubr.msk.bf16.gmra.mrb[32].mxu1 %vm452_vm2, %v451_v50  ;;  %v5837_v50 = vld [vmem:[%s5464_s9 + $0x28] sm:$0xff]  }
  0x66   : > { %4584 = vmatprep.mubr.msk.bf16.mxu1 %vm452_vm2, %v5474_v9  ;;  %v5751_v9 = vld [vmem:[%s6384_s1 + $0x6] sm:$0x3]  ;;  %v2555_v44 = vrot.slane %v5837_v50, 2 }
  0x68   : > { %4749 = vmatmul.mubr.msk.bf16.gmra.mrb[12].mxu0 %vm452_vm2, %v2127_v52  ;;  %v2554_v52 = vsel %vm2110_vm4, %v2551_v43, %v2553_v23 }
  0x69   : > { %4752 = vmatprep.mubr.msk.bf16.mxu0 %vm452_vm2, %v2129_v53  ;;  %v5849_v53 = vld [vmem:[%s5464_s9 + $0x30] sm:$0xff]  }
  0x6d   : > { %4585 = vmatmul.mubr.msk.bf16.vlgmr.msra.gmra.mrb[0].mxu1 %vm452_vm2, %v5477_v10 }
  0x6e   : > { %4588 = vmatprep.mubr.msk.bf16.mxu1 %vm452_vm2, %v5492_v19  ;;  %4621 = vmatpush3.bf16.msra.mxu1 %v1003_v14  ;;  %v2556_v14 = vsel %vm2110_vm4, %v2553_v23, %v2555_v44  ;;  %v916_v23 = vrot.slane %v5506_v33, 1 }
  0x6f   : > { %5179 = vmatprep.subr.msk.bf16.mxu1 %vm507_vm0, %v5751_v9 }
  0x70   : > { %4753 = vmatmul.mubr.msk.bf16.gmra.mrb[16].mxu0 %vm452_vm2, %v2131_v29  ;;  %v5860_v29 = vld [vmem:[%s6384_s1 + $0x10] sm:$0x3] }
  0x71   : > { %4756 = vmatprep.mubr.msk.bf16.mxu0 %vm452_vm2, %v2133_v39  ;;  %v2557_v39 = vrot.slane %v5849_v53, 2 }
  0x73   : > { %v2558_v34 = vsel %vm2110_vm4, %v2555_v44, %v2557_v39 }
  0x75   : > { %4589 = vmatmul.mubr.msk.bf16.gmra.mrb[4].mxu1 %vm452_vm2, %v5506_v33 }
  0x76   : > { %4592 = vmatprep.mubr.msk.bf16.mxu1 %vm452_vm2, %v5524_v48 }
  0x78   : > { %4757 = vmatmul.mubr.msk.bf16.gmra.mrb[20].mxu0 %vm452_vm2, %v2135_v5  ;;  %v2560_v5 = vsel %vm2110_vm4, %v2557_v39, %v2559_v61  ;;  %v1442_v39 = vsel %vm507_vm0, %v5751_v9, 0  ;;  %v918_v61 = vrot.slane %v5524_v48, 1  ;;  %v5292_v9 = vld [vmem:[%s6384_s1 + $0x8] sm:$0x3] }
  0x79   : > { %4760 = vmatprep.mubr.msk.bf16.mxu0 %vm452_vm2, %v2137_v1  ;;  %v5878_v1 = vld [vmem:[%s5464_s9 + $0x48] sm:$0xff]  }
  0x7a   : > { %v919_v48 = vsel %vm910_vm5, %v916_v23, %v918_v61 }
  0x7d   : > { %4593 = vmatmul.mubr.msk.bf16.gmra.mrb[8].mxu1 %vm452_vm2, %v5533_v54 }
  0x7e   : > { %4596 = vmatprep.mubr.msk.bf16.mxu1 %vm452_vm2, %v5544_v0 }
  0x80   : > { %4761 = vmatmul.mubr.msk.bf16.gmra.mrb[24].mxu0 %vm452_vm2, %v2139_v21  ;;  %v4015_v21 = vcombine.low %v904_v16, %v5471_v8  ;;  %v5897_v8 = vld [vmem:[%s5464_s9 + $0x58] sm:$0xff]   ;;  %v920_v16 = vrot.slane %v5533_v54, 1 }
  0x81   : > { %4764 = vmatprep.mubr.msk.bf16.mxu0 %vm452_vm2, %v2141_v24  ;;  %v2563_v24 = vrot.slane %v5878_v1, 2  ;;  %v2567_v43 = vrot.slane %v5897_v8, 2 }
  0x82   : > { %v911_v30 = vrot.slane %v4015_v21, 1  ;;  %v5939_v21 = vld [vmem:[%s5464_s9 + $0x78] sm:$0xff]   ;;  %v921_v54 = vsel %vm910_vm5, %v918_v61, %v920_v16 }
  0x83   : > { %v2568_v44 = vsel %vm2110_vm4, %v2565_v42, %v2567_v43 }
  0x85   : > { %4597 = vmatmul.mubr.msk.bf16.gmra.mrb[12].mxu1 %vm452_vm2, %v5572_v35 }
  0x86   : > { %4600 = vmatprep.mubr.msk.bf16.mxu1 %vm452_vm2, %v5588_v51 }
  0x88   : > { %4765 = vmatmul.mubr.msk.bf16.gmra.mrb[28].mxu0 %vm452_vm2, %v2143_v6  ;;  %v912_v6 = vrot.slane %v5477_v10, 1  ;;  %v914_v10 = vrot.slane %v5492_v19, 1 }
  0x89   : > { %4768 = vmatprep.mubr.msk.bf16.mxu0 %vm452_vm2, %v2145_v36  ;;  %v2564_v36 = vsel %vm2110_vm4, %v2561_v17, %v2563_v24 }
  0x8a   : > { %v913_v18 = vsel %vm910_vm5, %v911_v30, %v912_v6  ;;  %v922_v30 = vrot.slane %v5544_v0, 1 }
  0x8d   : > { %4601 = vmatmul.mubr.msk.bf16.gmra.mrb[16].mxu1 %vm452_vm2, %v5599_v63 }
  0x8e   : > { %4604 = vmatprep.mubr.msk.bf16.mxu1 %vm452_vm2, %v5616_v25 }
  0x90   : > { %4769 = vmatmul.mubr.msk.bf16.gmra.mrb[32].mxu0 %vm452_vm2, %v2147_v45  ;;  %v2566_v45 = vsel %vm2110_vm4, %v2563_v24, %v2565_v42  ;;  %v924_v42 = vrot.slane %v5572_v35, 1  ;;  %v926_v35 = vrot.slane %v5588_v51, 1 }
  0x91   : > { %4774 = vmatprep.mubr.msk.bf16.mxu0 %vm452_vm2, %v2552_v47  ;;  %v5910_v47 = vld [vmem:[%s5464_s9 + $0x60] sm:$0xff]  }
  0x92   : > { %v2569_v19 = vrot.slane %v5910_v47, 2 }
  0x95   : > { %4605 = vmatmul.mubr.msk.bf16.gmra.mrb[20].mxu1 %vm452_vm2, %v5626_v41 }
  0x96   : > { %4608 = vmatprep.mubr.msk.bf16.mxu1 %vm452_vm2, %v5640_v58 }
  0x98   : > { %4775 = vmatmul.mubr.msk.bf16.vlgmr.msra.gmra.mrb[0].mxu0 %vm452_vm2, %v2554_v52  ;;  %v5915_v52 = vld [vmem:[%s5464_s9 + $0x68] sm:$0xff]  }
  0x99   : > { %4811 = vmatpush3.bf16.msra.mxu0 %v3089_v62  ;;  %4778 = vmatprep.mubr.msk.bf16.mxu0 %vm452_vm2, %v2556_v14  ;;  %v915_v62 = vsel %vm910_vm5, %v912_v6, %v914_v10  ;;  %v917_v14 = vsel %vm910_vm5, %v914_v10, %v916_v23  ;;  %v2571_v33 = vrot.slane %v5915_v52, 2  ;;  %v923_v10 = vsel %vm910_vm5, %v920_v16, %v922_v30 }
  0x9a   : > { %5185 = vmatprep.subr.msk.bf16.mxu0 %vm507_vm0, %v5860_v29  ;;  %v2865_v16 = vshrl.u32 %v5817_v37, 16 }
  0x9b   : > { %v2572_v17 = vsel %vm2110_vm4, %v2569_v19, %v2571_v33 }
  0x9d   : > { %4609 = vmatmul.mubr.msk.bf16.gmra.mrb[24].mxu1 %vm452_vm2, %v5645_v11 }
  0x9e   : > { %4612 = vmatprep.mubr.msk.bf16.mxu1 %vm452_vm2, %v5662_v32 }
  0xa0   : > { %4779 = vmatmul.mubr.msk.bf16.gmra.mrb[4].mxu0 %vm452_vm2, %v2558_v34  ;;  %v2570_v34 = vsel %vm2110_vm4, %v2567_v43, %v2569_v19  ;;  %v5957_v43 = vld [vmem:[%s5464_s9 + $0x88] sm:$0xff]   ;;  %v928_v19 = vrot.slane %v5599_v63, 1  ;;  %v2868_v63 = vshll.u32 %v5817_v37, 16 }
  0xa1   : > { %4782 = vmatprep.mubr.msk.bf16.mxu0 %vm452_vm2, %v2560_v5  ;;  %v5930_v5 = vld [vmem:[%s5464_s9 + $0x70] sm:$0xff]   ;;  %v2579_v23 = vrot.slane %v5957_v43, 2 }
  0xa2   : > { %v2573_v24 = vrot.slane %v5930_v5, 2  ;;  %v929_v51 = vsel %vm910_vm5, %v926_v35, %v928_v19 }
  0xa4   : > { %v2574_v6 = vsel %vm2110_vm4, %v2571_v33, %v2573_v24  ;;  %v927_v33 = vsel %vm910_vm5, %v924_v42, %v926_v35 }
  0xa5   : > { %4613 = vmatmul.mubr.msk.bf16.gmra.mrb[28].mxu1 %vm452_vm2, %v5668_v40 }
  0xa6   : > { %4616 = vmatprep.mubr.msk.bf16.mxu1 %vm452_vm2, %v5683_v56 }
  0xa8   : > { %4783 = vmatmul.mubr.msk.bf16.gmra.mrb[8].mxu0 %vm452_vm2, %v2562_v49  ;;  %v2575_v49 = vrot.slane %v5939_v21, 2 }
  0xa9   : > { %4786 = vmatprep.mubr.msk.bf16.mxu0 %vm452_vm2, %v2564_v36  ;;  %v5952_v36 = vld [vmem:[%s5464_s9 + $0x80] sm:$0xff]  }
  0xaa   : > { %v2577_v0 = vrot.slane %v5952_v36, 2 }
  0xad   : > { %4617 = vmatmul.mubr.msk.bf16.gmra.mrb[32].mxu1 %vm452_vm2, %v5690_v4 }
  0xae   : > { %4622 = vmatprep.mubr.msk.bf16.mxu1 %vm452_vm2, %v913_v18  ;;  %v2576_v18 = vsel %vm2110_vm4, %v2573_v24, %v2575_v49 }
  0xb0   : > { %4787 = vmatmul.mubr.msk.bf16.gmra.mrb[12].mxu0 %vm452_vm2, %v2566_v45  ;;  %v925_v45 = vsel %vm910_vm5, %v922_v30, %v924_v42  ;;  %v932_v30 = vrot.slane %v5626_v41, 1  ;;  %v2870_v42 = vrot.slane %v2868_v63, 3  ;;  %v2891_v41 = vshrl.u32 %v5837_v50, 16 }
  0xb1   : > { %4790 = vmatprep.mubr.msk.bf16.mxu0 %vm452_vm2, %v2568_v44  ;;  %v2578_v44 = vsel %vm2110_vm4, %v2575_v49, %v2577_v0  ;;  %v5288_v49 = vld [vmem:[%s5464_s9 + $0xa0] ss:$0 sps:$4 sm:$0x33]  }
  0xb5   : > { %4623 = vmatmul.mubr.msk.bf16.vlgmr.msra.gmra.mrb[0].mxu1 %vm452_vm2, %v915_v62  ;;  %v5970_v62 = vld [vmem:[%s5464_s9 + $0x90] sm:$0xff]  }
  0xb6   : > { %4626 = vmatprep.mubr.msk.bf16.mxu1 %vm452_vm2, %v917_v14  ;;  %4659 = vmatpush3.bf16.msra.mxu1 %v1442_v39  ;;  %v5974_v14 = vld [vmem:[%s5464_s9 + $0x98] sm:$0xff]   ;;  %v2580_v39 = vsel %vm2110_vm4, %v2577_v0, %v2579_v23  ;;  %v2581_v61 = vrot.slane %v5970_v62, 2  ;;  %v2585_v0 = vrot.slane %v5288_v49, 2 }
  0xb7   : > { %5181 = vmatprep.subr.msk.bf16.mxu1 %vm507_vm0, %v5292_v9  ;;  %v2873_v9 = vshrl.u32 %v5820_v38, 16 }
  0xb8   : > { %4791 = vmatmul.mubr.msk.bf16.gmra.mrb[16].mxu0 %vm452_vm2, %v2570_v34  ;;  %v2583_v34 = vrot.slane %v5974_v14, 2  ;;  %v2582_v24 = vsel %vm2110_vm4, %v2579_v23, %v2581_v61  ;;  %v2885_v23 = vshll.u32 %v5833_v46, 16 }
  0xb9   : > { %4794 = vmatprep.mubr.msk.bf16.mxu0 %vm452_vm2, %v2572_v17  ;;  %v2876_v17 = vshll.u32 %v5820_v38, 16  ;;  %v2875_v37 = vrot.slane %v2873_v9, 2  ;;  %v2893_v9 = vrot.slane %v2891_v41, 2  ;;  %v2918_v41 = vshrl.u32 %v5874_v3, 16 }
  0xbd   : > { %4627 = vmatmul.mubr.msk.bf16.gmra.mrb[4].mxu1 %vm452_vm2, %v919_v48  ;;  %v930_v48 = vrot.slane %v5616_v25, 1 }
  0xbe   : > { %4630 = vmatprep.mubr.msk.bf16.mxu1 %vm452_vm2, %v921_v54  ;;  %v2584_v54 = vsel %vm2110_vm4, %v2581_v61, %v2583_v34 }
  0xbf   : > { %v933_v25 = vsel %vm910_vm5, %v930_v48, %v932_v30 }
  0xc0   : > { %4795 = vmatmul.mubr.msk.bf16.gmra.mrb[20].mxu0 %vm452_vm2, %v2574_v6  ;;  %v2867_v6 = vrot.slane %v2865_v16, 2  ;;  %v936_v16 = vrot.slane %v5645_v11, 1  ;;  %v2909_v11 = vshrl.u32 %v5855_v28, 16 }
  0xc1   : > { %4798 = vmatprep.mubr.msk.bf16.mxu0 %vm452_vm2, %v2576_v18  ;;  %v2878_v18 = vrot.slane %v2876_v17, 3 }
  0xc2   : > { %v2871_v35 = vor.u32 %v2870_v42, %v2867_v6  ;;  %v2912_v6 = vshll.u32 %v5855_v28, 16 }
  0xc5   : > { %4631 = vmatmul.mubr.msk.bf16.gmra.mrb[8].mxu1 %vm452_vm2, %v923_v10  ;;  %v931_v10 = vsel %vm910_vm5, %v928_v19, %v930_v48  ;;  %v934_v19 = vrot.slane %v5640_v58, 1  ;;  %v2900_v58 = vshrl.u32 %v5849_v53, 16 }
  0xc6   : > { %4634 = vmatprep.mubr.msk.bf16.mxu1 %vm452_vm2, %v925_v45  ;;  %v2882_v45 = vshrl.u32 %v5833_v46, 16 }
  0xc7   : > { %v935_v48 = vsel %vm910_vm5, %v932_v30, %v934_v19  ;;  %v938_v30 = vrot.slane %v5662_v32, 1  ;;  %v2921_v32 = vshll.u32 %v5874_v3, 16 }
  0xc8   : > { %4799 = vmatmul.mubr.msk.bf16.gmra.mrb[24].mxu0 %vm452_vm2, %v2578_v44  ;;  %v2879_v44 = vor.u32 %v2878_v18, %v2875_v37  ;;  %v2884_v61 = vrot.slane %v2882_v45, 2  ;;  %v2902_v37 = vrot.slane %v2900_v58, 2  ;;  %v2911_v45 = vrot.slane %v2909_v11, 2 }
  0xc9   : > { %4802 = vmatprep.mubr.msk.bf16.mxu0 %vm452_vm2, %v2580_v39  ;;  %v2894_v39 = vshll.u32 %v5837_v50, 16  ;;  %v2936_v58 = vshrl.u32 %v5892_v13, 16  ;;  %v2948_v11 = vshll.u32 %v5897_v8, 16 }
  0xca   : > { %v2880_v63 = vsel %vm2863_vm6, %v2871_v35, %v2879_v44  ;;  %v939_v35 = vsel %vm910_vm5, %v936_v16, %v938_v30 }
  0xcb   : > { %v2896_v17 = vrot.slane %v2894_v39, 3 }
  0xcd   : > { %4635 = vmatmul.mubr.msk.bf16.gmra.mrb[12].mxu1 %vm452_vm2, %v927_v33  ;;  %v2586_v33 = vsel %vm2110_vm4, %v2583_v34, %v2585_v0  ;;  %v2903_v34 = vshll.u32 %v5849_v53, 16  ;;  %v2897_v49 = vor.u32 %v2896_v17, %v2893_v9  ;;  %v3403_v0 = vsel %vm507_vm0, %v5860_v29, 0 }
  0xce   : > { %4638 = vmatprep.mubr.msk.bf16.mxu1 %vm452_vm2, %v929_v51  ;;  %v2887_v51 = vrot.slane %v2885_v23, 3  ;;  %v2914_v23 = vrot.slane %v2912_v6, 3  ;;  %v2927_v29 = vshrl.u32 %v5878_v1, 16 }
  0xcf   : > { %v2905_v18 = vrot.slane %v2903_v34, 3  ;;  %v2939_v34 = vshll.u32 %v5892_v13, 16 }
  0xd0   : > { %4803 = vmatmul.mubr.msk.bf16.gmra.mrb[28].mxu0 %vm452_vm2, %v2582_v24  ;;  %v2888_v24 = vor.u32 %v2887_v51, %v2884_v61  ;;  %v2915_v39 = vor.u32 %v2914_v23, %v2911_v45  ;;  %v2920_v61 = vrot.slane %v2918_v41, 2  ;;  %v2923_v51 = vrot.slane %v2921_v32, 3 }
  0xd1   : > { %4806 = vmatprep.mubr.msk.bf16.mxu0 %vm452_vm2, %v2584_v54  ;;  %v937_v54 = vsel %vm910_vm5, %v934_v19, %v936_v16  ;;  %v2930_v19 = vshll.u32 %v5878_v1, 16  ;;  %v2929_v17 = vrot.slane %v2927_v29, 2  ;;  %v2950_v23 = vrot.slane %v2948_v11, 3  ;;  %v5294_v29 = vld [vmem:[%s5464_s9 + $0x18] sm:$0xff]  }
  0xd2   : > { %v2889_v42 = vsel %vm2863_vm6, %v2879_v44, %v2888_v24  ;;  %v2906_v44 = vor.u32 %v2905_v18, %v2902_v37  ;;  %v2941_v37 = vrot.slane %v2939_v34, 3  ;;  %v1350_v18 = vrot.slane %v5495_v20, 1 }
  0xd3   : > { %v2954_v32 = vshrl.u32 %v5910_v47, 16  ;;  %v2957_v20 = vshll.u32 %v5910_v47, 16  ;;  %v2975_v34 = vshll.u32 %v5930_v5, 16  ;;  %v2984_v11 = vshll.u32 %v5939_v21, 16 }
  0xd4   : > { %v2907_v16 = vsel %vm2863_vm6, %v2897_v49, %v2906_v44  ;;  %v2916_v9 = vsel %vm2863_vm6, %v2906_v44, %v2915_v39 }
  0xd5   : > { %4639 = vmatmul.mubr.msk.bf16.gmra.mrb[16].mxu1 %vm452_vm2, %v931_v10  ;;  %v940_v10 = vrot.slane %v5668_v40, 1 }
  0xd6   : > { %4642 = vmatprep.mubr.msk.bf16.mxu1 %vm452_vm2, %v933_v25  ;;  %v2898_v25 = vsel %vm2863_vm6, %v2888_v24, %v2897_v49 }
  0xd7   : > { %v941_v40 = vsel %vm910_vm5, %v938_v30, %v940_v10  ;;  %v946_v30 = vrot.slane %v5713_v27, 1 }
  0xd8   : > { %4807 = vmatmul.mubr.msk.bf16.gmra.mrb[32].mxu0 %vm452_vm2, %v2586_v33  ;;  %v942_v33 = vrot.slane %v5683_v56, 1 }
  0xd9   : > { %4812 = vmatprep.mubr.msk.bf16.mxu0 %vm452_vm2, %v2880_v63  ;;  %v944_v63 = vrot.slane %v5690_v4, 1  ;;  %v2945_v4 = vshrl.u32 %v5897_v8, 16 }
  0xda   : > { %v943_v24 = vsel %vm910_vm5, %v940_v10, %v942_v33  ;;  %v5293_v10 = vld [vmem:[%s5464_s9 + $0x10] sm:$0xff]  }
  0xdb   : > { %v945_v56 = vsel %vm910_vm5, %v942_v33, %v944_v63  ;;  %v2947_v45 = vrot.slane %v2945_v4, 2  ;;  %v2981_v4 = vshrl.u32 %v5939_v21, 16 }
  0xdd   : > { %4643 = vmatmul.mubr.msk.bf16.gmra.mrb[20].mxu1 %vm452_vm2, %v935_v48  ;;  %v2932_v48 = vrot.slane %v2930_v19, 3  ;;  %v2951_v44 = vor.u32 %v2950_v23, %v2947_v45  ;;  %v1353_v19 = vrot.slane %v5294_v29, 1  ;;  %v2983_v45 = vrot.slane %v2981_v4, 2 }
  0xde   : > { %4646 = vmatprep.mubr.msk.bf16.mxu1 %vm452_vm2, %v937_v54  ;;  %v2924_v54 = vor.u32 %v2923_v51, %v2920_v61  ;;  %v2956_v61 = vrot.slane %v2954_v32, 2  ;;  %v2959_v51 = vrot.slane %v2957_v20, 3  ;;  %v2986_v23 = vrot.slane %v2984_v11, 3  ;;  %v5300_v11 = vld [vmem:[%s5464_s9 + $0x48] sm:$0xff]  }
  0xdf   : > { %v2933_v49 = vor.u32 %v2932_v48, %v2929_v17  ;;  %v2993_v32 = vshll.u32 %v5952_v36, 16  ;;  %v3020_v4 = vshll.u32 %v5974_v14, 16 }
  0xe0   : > { %4813 = vmatmul.mubr.msk.bf16.vlgmr.msra.gmra.mrb[0].mxu0 %vm452_vm2, %v2889_v42  ;;  %v2925_v6 = vsel %vm2863_vm6, %v2915_v39, %v2924_v54  ;;  %v2938_v42 = vrot.slane %v2936_v58, 2  ;;  %v2966_v39 = vshll.u32 %v5915_v52, 16  ;;  %v2972_v58 = vshrl.u32 %v5930_v5, 16 }
  0xe1   : > { %4849 = vmatpush3.bf16.msra.mxu0 %v3403_v0  ;;  %4816 = vmatprep.mubr.msk.bf16.mxu0 %vm452_vm2, %v2898_v25  ;;  %v1351_v0 = vrot.slane %v5293_v10, 1  ;;  %v2934_v25 = vsel %vm2863_vm6, %v2924_v54, %v2933_v49  ;;  %v2960_v54 = vor.u32 %v2959_v51, %v2956_v61  ;;  %v5297_v10 = vld [vmem:[%s5464_s9 + $0x30] sm:$0xff]   ;;  %v2987_v20 = vor.u32 %v2986_v23, %v2983_v45  ;;  %v5299_v51 = vld [vmem:[%s5464_s9 + $0x40] sm:$0xff]  }
  0xe2   : > { %v2942_v41 = vor.u32 %v2941_v37, %v2938_v42  ;;  %v2968_v48 = vrot.slane %v2966_v39, 3  ;;  %v2974_v37 = vrot.slane %v2972_v58, 2  ;;  %v5298_v39 = vld [vmem:[%s5464_s9 + $0x38] sm:$0xff]   ;;  %v2995_v61 = vrot.slane %v2993_v32, 3 }
  0xe3   : > { %v1352_v27 = vsel %vm910_vm5, %v1350_v18, %v1351_v0  ;;  %v2961_v42 = vsel %vm2863_vm6, %v2951_v44, %v2960_v54  ;;  %v2977_v18 = vrot.slane %v2975_v34, 3  ;;  %v1361_v29 = vrot.slane %v5298_v39, 1 }
  0xe4   : > { %v2943_v33 = vsel %vm2863_vm6, %v2933_v49, %v2942_v41  ;;  %v3011_v58 = vshll.u32 %v5970_v62, 16  ;;  %v3022_v23 = vrot.slane %v3020_v4, 3  ;;  %v3316_v4 = vrot.slane %v5837_v50, 3 }
  0xe5   : > { %4647 = vmatmul.mubr.msk.bf16.gmra.mrb[24].mxu1 %vm452_vm2, %v939_v35  ;;  %v947_v35 = vsel %vm910_vm5, %v944_v63, %v946_v30  ;;  %v3318_v50 = vrot.slane %v5849_v53, 3 }
  0xe6   : > { %4650 = vmatprep.mubr.msk.bf16.mxu1 %vm452_vm2, %v941_v40  ;;  %v2963_v40 = vshrl.u32 %v5915_v52, 16 }
  0xe8   : > { %4817 = vmatmul.mubr.msk.bf16.gmra.mrb[4].mxu0 %vm452_vm2, %v2907_v16  ;;  %v5295_v16 = vld [vmem:[%s5464_s9 + $0x20] sm:$0xff]   ;;  %v2965_v17 = vrot.slane %v2963_v40, 2  ;;  %v3002_v40 = vshll.u32 %v5957_v43, 16 }
  0xe9   : > { %4820 = vmatprep.mubr.msk.bf16.mxu0 %vm452_vm2, %v2916_v9  ;;  %v1355_v63 = vrot.slane %v5295_v16, 1  ;;  %v2952_v9 = vsel %vm2863_vm6, %v2942_v41, %v2951_v44  ;;  %v2978_v41 = vor.u32 %v2977_v18, %v2974_v37  ;;  %v2999_v44 = vshrl.u32 %v5957_v43, 16  ;;  %v5301_v18 = vld [vmem:[%s5464_s9 + $0x50] sm:$0xff]  }
  0xea   : > { %v2969_v49 = vor.u32 %v2968_v48, %v2965_v17  ;;  %v1363_v16 = vrot.slane %v5299_v51, 1  ;;  %v3004_v17 = vrot.slane %v3002_v40, 3  ;;  %v3013_v37 = vrot.slane %v3011_v58, 3  ;;  %v5302_v40 = vld [vmem:[%s5464_s9 + $0x58] sm:$0xff]  }
  0xeb   : > { %v1369_v39 = vrot.slane %v5302_v40, 1  ;;  %v1772_v40 = vshrl.u32 %v5759_v57, 16 }
  0xed   : > { %4651 = vmatmul.mubr.msk.bf16.gmra.mrb[28].mxu1 %vm452_vm2, %v943_v24  ;;  %v1354_v24 = vsel %vm910_vm5, %v1351_v0, %v1353_v19  ;;  %v1359_v0 = vrot.slane %v5297_v10, 1  ;;  %v1367_v10 = vrot.slane %v5301_v18, 1  ;;  %v3320_v18 = vrot.slane %v5855_v28, 3 }
  0xee   : > { %4654 = vmatprep.mubr.msk.bf16.mxu1 %vm452_vm2, %v945_v56  ;;  %v1356_v56 = vsel %vm910_vm5, %v1353_v19, %v1355_v63  ;;  %v2979_v19 = vsel %vm2863_vm6, %v2969_v49, %v2978_v41 }
  0xef   : > { %v1362_v48 = vsel %vm910_vm5, %v1359_v0, %v1361_v29  ;;  %v3321_v53 = vsel %vm3310_vm7, %v3318_v50, %v3320_v18 }
  0xf0   : > { %4821 = vmatmul.mubr.msk.bf16.gmra.mrb[8].mxu0 %vm452_vm2, %v2925_v6  ;;  %v5296_v6 = vld [vmem:[%s5464_s9 + $0x28] sm:$0xff]  }
  0xf1   : > { %4824 = vmatprep.mubr.msk.bf16.mxu0 %vm452_vm2, %v2934_v25  ;;  %v1357_v30 = vrot.slane %v5296_v6, 1  ;;  %v2970_v25 = vsel %vm2863_vm6, %v2960_v54, %v2969_v49  ;;  %v1364_v54 = vsel %vm910_vm5, %v1361_v29, %v1363_v16  ;;  %v3017_v49 = vshrl.u32 %v5974_v14, 16 }
  0xf2   : > { %v1365_v6 = vrot.slane %v5300_v11, 1  ;;  %v1377_v11 = vrot.slane %v5777_v7, 1 }
  0xf3   : > { %v3019_v45 = vrot.slane %v3017_v49, 2 }
  0xf5   : > { %4655 = vmatmul.mubr.msk.bf16.gmra.mrb[32].mxu1 %vm452_vm2, %v947_v35  ;;  %v1358_v35 = vsel %vm910_vm5, %v1355_v63, %v1357_v30  ;;  %v2988_v63 = vsel %vm2863_vm6, %v2978_v41, %v2987_v20 }
  0xf6   : > { %4660 = vmatprep.mubr.msk.bf16.mxu1 %vm452_vm2, %v1352_v27  ;;  %v2990_v27 = vshrl.u32 %v5952_v36, 16 }
  0xf8   : > { %4825 = vmatmul.mubr.msk.bf16.gmra.mrb[12].mxu0 %vm452_vm2, %v2943_v33  ;;  %v2992_v33 = vrot.slane %v2990_v27, 2 }
  0xf9   : > { %4828 = vmatprep.mubr.msk.bf16.mxu0 %vm452_vm2, %v2952_v9  ;;  %v3001_v9 = vrot.slane %v2999_v44, 2  ;;  %v3304_v44 = vld [vmem:[%s5464_s9 + $0x10] sm:$0x8] }
  0xfb   : > { %v3005_v34 = vor.u32 %v3004_v17, %v3001_v9 }
  0xfd   : > { %4661 = vmatmul.mubr.msk.bf16.vlgmr.msra.gmra.mrb[0].mxu1 %vm452_vm2, %v1354_v24  ;;  %v2996_v24 = vor.u32 %v2995_v61, %v2992_v33  ;;  %v1371_v61 = vrot.slane %v5740_v55, 1 }
  0xfe   : > { %4664 = vmatprep.mubr.msk.bf16.mxu1 %vm452_vm2, %v1356_v56  ;;  %4887 = vmatpush3.bf16.msra.mxu1 %v5448_v2  ;;  %v1360_v2 = vsel %vm910_vm5, %v1357_v30, %v1359_v0  ;;  %v3008_v56 = vshrl.u32 %v5970_v62, 16  ;;  %v6110_v0 = vld [vmem:[%s5464_s9 + $0xa0] ss:$0 sps:$4 sm:$0x77]  }
  0xff   : > { %v2997_v30 = vsel %vm2863_vm6, %v2987_v20, %v2996_v24  ;;  %v3026_v27 = vshrl.u32 %v6110_v0, 16  ;;  %v3029_v32 = vshll.u32 %v6110_v0, 16  ;;  %v3023_v20 = vor.u32 %v3022_v23, %v3019_v45 }
 0x100   : > { %4829 = vmatmul.mubr.msk.bf16.gmra.mrb[16].mxu0 %vm452_vm2, %v2961_v42  ;;  %v3010_v42 = vrot.slane %v3008_v56, 2  ;;  %v1372_v17 = vsel %vm910_vm5, %v1369_v39, %v1371_v61  ;;  %v1375_v56 = vrot.slane %v5765_v60, 1  ;;  %v1383_v45 = vrot.slane %v5797_v26, 1 }
 0x101   : > { %4832 = vmatprep.mubr.msk.bf16.mxu0 %vm452_vm2, %v2970_v25  ;;  %v3006_v25 = vsel %vm2863_vm6, %v2996_v24, %v3005_v34  ;;  %v3031_v33 = vrot.slane %v3029_v32, 3  ;;  %v3312_v24 = vrot.slane %v5820_v38, 3  ;;  %v3314_v38 = vrot.slane %v5833_v46, 3 }
 0x102   : > { %v3014_v41 = vor.u32 %v3013_v37, %v3010_v42  ;;  %v1378_v46 = vsel %vm910_vm5, %v1375_v56, %v1377_v11  ;;  %v1763_v23 = vshrl.u32 %v5740_v55, 16 }
 0x103   : > { %v3317_v42 = vsel %vm3310_vm7, %v3314_v38, %v3316_v4 }
 0x104   : > { %v3015_v29 = vsel %vm2863_vm6, %v3005_v34, %v3014_v41  ;;  %v3024_v51 = vsel %vm2863_vm6, %v3014_v41, %v3023_v20  ;;  %v5291_v41 = vld [vmem:[%s5464_s9 + $0x98] ss:$0 sps:$4 sm:$0x11]   ;;  %v1765_v32 = vrot.slane %v1763_v23, 1  ;;  %s5188_s9 = smul.u32 2304, %s5411_s16  ;;  %s6342_s16 = scalar_lea.sflag [#allocation3], %s161_s6 }
 0x105   : > { %4665 = vmatmul.mubr.msk.bf16.gmra.mrb[4].mxu1 %vm452_vm2, %v1358_v35  ;;  %v1366_v35 = vsel %vm910_vm5, %v1363_v16, %v1365_v6  ;;  %v4171_v16 = vcombine.low %v3304_v44, %v5807_v31  ;;  %v3324_v44 = vrot.slane %v5878_v1, 3 }
 0x106   : > { %4668 = vmatprep.mubr.msk.bf16.mxu1 %vm452_vm2, %v1360_v2  ;;  %v1368_v2 = vsel %vm910_vm5, %v1365_v6, %v1367_v10  ;;  %v3315_v6 = vsel %vm3310_vm7, %v3312_v24, %v3314_v38  ;;  %s6334_s19 = scalar_lea.hbm %s6386_s3, %s5188_s9 }
 0x108   : > { %4833 = vmatmul.mubr.msk.bf16.gmra.mrb[20].mxu0 %vm452_vm2, %v2979_v19  ;;  %v3028_v19 = vrot.slane %v3026_v27, 2 }
 0x109   : > { %4836 = vmatprep.mubr.msk.bf16.mxu0 %vm452_vm2, %v2988_v63  ;;  %v1370_v63 = vsel %vm910_vm5, %v1367_v10, %v1369_v39  ;;  %v1381_v10 = vrot.slane %v5793_v22, 1  ;;  %v1775_v39 = vshll.u32 %v5759_v57, 16 }
 0x10a   : > { %v3032_v9 = vor.u32 %v3031_v33, %v3028_v19  ;;  %v1784_v33 = vshll.u32 %v5765_v60, 16 }
 0x10b   : > { %v1384_v27 = vsel %vm910_vm5, %v1381_v10, %v1383_v45 }
 0x10c   : > { %v3033_v31 = vsel %vm2863_vm6, %v3023_v20, %v3032_v9 }
 0x10d   : > { %4669 = vmatmul.mubr.msk.bf16.gmra.mrb[8].mxu1 %vm452_vm2, %v1362_v48  ;;  %v3311_v48 = vrot.slane %v4171_v16, 3  ;;  %v1777_v16 = vrot.slane %v1775_v39, 2 }
 0x10e   : > { %4672 = vmatprep.mubr.msk.bf16.mxu1 %vm452_vm2, %v1364_v54  ;;  %v1373_v54 = vrot.slane %v5759_v57, 1 }
 0x10f   : > { %v3313_v58 = vsel %vm3310_vm7, %v3311_v48, %v3312_v24  ;;  %v3328_v48 = vrot.slane %v5897_v8, 3  ;;  %v1790_v24 = vshrl.u32 %v5777_v7, 16 }
 0x110   : > { %4837 = vmatmul.mubr.msk.bf16.gmra.mrb[24].mxu0 %vm452_vm2, %v2997_v30  ;;  %v1374_v34 = vsel %vm910_vm5, %v1371_v61, %v1373_v54  ;;  %v1376_v49 = vsel %vm910_vm5, %v1373_v54, %v1375_v56  ;;  %v1379_v30 = vrot.slane %v5781_v12, 1  ;;  %v1793_v54 = vshll.u32 %v5777_v7, 16 }
 0x111   : > { %4840 = vmatprep.mubr.msk.bf16.mxu0 %vm452_vm2, %v3006_v25  ;;  %v3319_v25 = vsel %vm3310_vm7, %v3316_v4, %v3318_v50 }
 0x112   : > { %v1380_v37 = vsel %vm910_vm5, %v1377_v11, %v1379_v30  ;;  %v1382_v28 = vsel %vm910_vm5, %v1379_v30, %v1381_v10  ;;  %v1795_v38 = vrot.slane %v1793_v54, 2  ;;  %v1808_v30 = vshrl.u32 %v5793_v22, 16 }
 0x114   : > { %v1810_v10 = vrot.slane %v1808_v30, 1 }
 0x115   : > { %4673 = vmatmul.mubr.msk.bf16.gmra.mrb[12].mxu1 %vm452_vm2, %v1366_v35  ;;  %v1766_v35 = vshll.u32 %v5740_v55, 16  ;;  %v1385_v55 = vrot.slane %v5291_v41, 1  ;;  %v1829_v41 = vshll.u32 %v5813_v59, 16 }
 0x116   : > { %4676 = vmatprep.mubr.msk.bf16.mxu1 %vm452_vm2, %v1368_v2  ;;  %v3322_v2 = vrot.slane %v5874_v3, 3  ;;  %v1781_v3 = vshrl.u32 %v5765_v60, 16 }
 0x117   : > { %v1768_v20 = vrot.slane %v1766_v35, 2  ;;  %v1386_v1 = vsel %vm910_vm5, %v1383_v45, %v1385_v55  ;;  %v3334_v45 = vrot.slane %v5930_v5, 3 }
 0x118   : > { %4841 = vmatmul.mubr.msk.bf16.gmra.mrb[28].mxu0 %vm452_vm2, %v3015_v29  ;;  %v3323_v29 = vsel %vm3310_vm7, %v3320_v18, %v3322_v2  ;;  %v3325_v61 = vsel %vm3310_vm7, %v3322_v2, %v3324_v44  ;;  %v1783_v9 = vrot.slane %v1781_v3, 1  ;;  %v3344_v3 = vrot.slane %v5974_v14, 3 }
 0x119   : > { %4844 = vmatprep.mubr.msk.bf16.mxu0 %vm452_vm2, %v3024_v51  ;;  %v1769_v19 = vor.u32 %v1768_v20, %v1765_v32  ;;  %v1774_v51 = vrot.slane %v1772_v40, 1  ;;  %v3340_v40 = vrot.slane %v5957_v43, 3 }
 0x11b   : > { %v1770_v57 = vsel %vm1663_vm3, %v5654_v15, %v1769_v19  ;;  %v1778_v60 = vor.u32 %v1777_v16, %v1774_v51  ;;  %v1802_v15 = vshll.u32 %v5781_v12, 16 }
 0x11d   : > { %4677 = vmatmul.mubr.msk.bf16.gmra.mrb[16].mxu1 %vm452_vm2, %v1370_v63  ;;  %v3326_v63 = vrot.slane %v5892_v13, 3  ;;  %v1799_v13 = vshrl.u32 %v5781_v12, 16  ;;  %v1779_v8 = vsel %vm1663_vm3, %v1769_v19, %v1778_v60  ;;  %v1804_v11 = vrot.slane %v1802_v15, 2 }
 0x11e   : > { %4680 = vmatprep.mubr.msk.bf16.mxu1 %vm452_vm2, %v1372_v17  ;;  %v1786_v17 = vrot.slane %v1784_v33, 2 }
 0x11f   : > { %v1801_v4 = vrot.slane %v1799_v13, 1 }
 0x120   : > { %4845 = vmatmul.mubr.msk.bf16.gmra.mrb[32].mxu0 %vm452_vm2, %v3033_v31  ;;  %v3327_v31 = vsel %vm3310_vm7, %v3324_v44, %v3326_v63  ;;  %v1787_v56 = vor.u32 %v1786_v17, %v1783_v9  ;;  %v3338_v44 = vrot.slane %v5952_v36, 3  ;;  %v3342_v36 = vrot.slane %v5970_v62, 3 }
 0x121   : > { %4850 = vmatprep.mubr.msk.bf16.mxu0 %vm452_vm2, %v3313_v58  ;;  %v3329_v58 = vsel %vm3310_vm7, %v3326_v63, %v3328_v48  ;;  %v1805_v50 = vor.u32 %v1804_v11, %v1801_v4 }
 0x122   : > { %v1788_v7 = vsel %vm1663_vm3, %v1778_v60, %v1787_v56  ;;  %v3343_v43 = vsel %vm3310_vm7, %v3340_v40, %v3342_v36  ;;  %v3345_v33 = vsel %vm3310_vm7, %v3342_v36, %v3344_v3 }
 0x125   : > { %4681 = vmatmul.mubr.msk.bf16.gmra.mrb[20].mxu1 %vm452_vm2, %v1374_v34  ;;  %v1792_v34 = vrot.slane %v1790_v24, 1 }
 0x126   : > { %4684 = vmatprep.mubr.msk.bf16.mxu1 %vm452_vm2, %v1376_v49  ;;  %v3330_v49 = vrot.slane %v5910_v47, 3  ;;  %v1817_v47 = vshrl.u32 %v5797_v26, 16 }
 0x127   : > { %v1796_v12 = vor.u32 %v1795_v38, %v1792_v34 }
 0x128   : > { %4851 = vmatmul.mubr.msk.bf16.vlgmr.msra.gmra.mrb[0].mxu0 %vm452_vm2, %v3315_v6  ;;  %v3332_v6 = vrot.slane %v5915_v52, 3  ;;  %v1819_v23 = vrot.slane %v1817_v47, 1 }
 0x129   : > { %4854 = vmatprep.mubr.msk.bf16.mxu0 %vm452_vm2, %v3317_v42  ;;  %v1811_v42 = vshll.u32 %v5793_v22, 16  ;;  %v1797_v52 = vsel %vm1663_vm3, %v1787_v56, %v1796_v12  ;;  %v1806_v22 = vsel %vm1663_vm3, %v1796_v12, %v1805_v50 }
 0x12a   : > { %v3333_v18 = vsel %vm3310_vm7, %v3330_v49, %v3332_v6  ;;  %v3335_v2 = vsel %vm3310_vm7, %v3332_v6, %v3334_v45 }
 0x12d   : > { %4685 = vmatmul.mubr.msk.bf16.gmra.mrb[24].mxu1 %vm452_vm2, %v1378_v46  ;;  %v3331_v46 = vsel %vm3310_vm7, %v3328_v48, %v3330_v49  ;;  %v6262_v49 = vld [vmem:[%s6385_s2] ss:$0 sm:$0xff] }
 0x12e   : > { %4688 = vmatprep.mubr.msk.bf16.mxu1 %vm452_vm2, %v1380_v37  ;;  %v1820_v37 = vshll.u32 %v5797_v26, 16 }
 0x130   : > { %4855 = vmatmul.mubr.msk.bf16.gmra.mrb[4].mxu0 %vm452_vm2, %v3319_v25  ;;  %v1813_v25 = vrot.slane %v1811_v42, 2  ;;  %v1822_v35 = vrot.slane %v1820_v37, 2 }
 0x131   : > { %4858 = vmatprep.mubr.msk.bf16.mxu0 %vm452_vm2, %v3321_v53  ;;  %v3336_v53 = vrot.slane %v5939_v21, 3  ;;  %v1831_v21 = vrot.slane %v1829_v41, 2 }
 0x132   : > { %v1814_v26 = vor.u32 %v1813_v25, %v1810_v10 }
 0x133   : > { %v3337_v5 = vsel %vm3310_vm7, %v3334_v45, %v3336_v53  ;;  %v3339_v39 = vsel %vm3310_vm7, %v3336_v53, %v3338_v44 }
 0x134   : > { %v1815_v32 = vsel %vm1663_vm3, %v1805_v50, %v1814_v26 }
 0x135   : > { %4689 = vmatmul.mubr.msk.bf16.gmra.mrb[28].mxu1 %vm452_vm2, %v1382_v28  ;;  %v1826_v28 = vshrl.u32 %v5813_v59, 16 }
 0x136   : > { %4692 = vmatprep.mubr.msk.bf16.mxu1 %vm452_vm2, %v1384_v27  ;;  %v1823_v27 = vor.u32 %v1822_v35, %v1819_v23 }
 0x137   : > { %v1828_v20 = vrot.slane %v1826_v28, 1 }
 0x138   : > { %4859 = vmatmul.mubr.msk.bf16.gmra.mrb[8].mxu0 %vm452_vm2, %v3323_v29  ;;  %v1824_v55 = vsel %vm1663_vm3, %v1814_v26, %v1823_v27  ;;  %v3341_v29 = vsel %vm3310_vm7, %v3338_v44, %v3340_v40 }
 0x139   : > { %4862 = vmatprep.mubr.msk.bf16.mxu0 %vm452_vm2, %v3325_v61  ;;  %v1832_v59 = vor.u32 %v1831_v21, %v1828_v20  ;;  %v3346_v61 = vrot.slane %v6110_v0, 3 }
 0x13b   : > { %v1833_v19 = vsel %vm1663_vm3, %v1823_v27, %v1832_v59 }
 0x13d   : > { %4693 = vmatmul.mubr.msk.bf16.gmra.mrb[32].mxu1 %vm452_vm2, %v1386_v1  ;;  %v3347_v1 = vsel %vm3310_vm7, %v3344_v3, %v3346_v61 }
 0x13e   : > { %4718 = vmatprep.mubr.msk.bf16.mxu1 %vm452_vm2, %v1770_v57 }
 0x140   : > { %4863 = vmatmul.mubr.msk.bf16.gmra.mrb[12].mxu0 %vm452_vm2, %v3327_v31 }
 0x141   : > { %4866 = vmatprep.mubr.msk.bf16.mxu0 %vm452_vm2, %v3329_v58 }
 0x145   : > { %4719 = vmatmul.mubr.msk.bf16.vlgmr.msra.gmra.mrb[20].mxu1 %vm452_vm2, %v1779_v8 }
 0x146   : > { %4722 = vmatprep.mubr.msk.bf16.mxu1 %vm452_vm2, %v1788_v7 }
 0x148   : > { %4867 = vmatmul.mubr.msk.bf16.gmra.mrb[16].mxu0 %vm452_vm2, %v3331_v46 }
 0x149   : > { %4870 = vmatprep.mubr.msk.bf16.mxu0 %vm452_vm2, %v3333_v18 }
 0x14d   : > { %4723 = vmatmul.mubr.msk.bf16.gmra.mrb[24].mxu1 %vm452_vm2, %v1797_v52 }
 0x14e   : > { %4726 = vmatprep.mubr.msk.bf16.mxu1 %vm452_vm2, %v1806_v22 }
 0x150   : > { %4871 = vmatmul.mubr.msk.bf16.gmra.mrb[20].mxu0 %vm452_vm2, %v3335_v2 }
 0x151   : > { %4874 = vmatprep.mubr.msk.bf16.mxu0 %vm452_vm2, %v3337_v5 }
 0x155   : > { %4727 = vmatmul.mubr.msk.bf16.gmra.mrb[28].mxu1 %vm452_vm2, %v1815_v32 }
 0x156   : > { %4730 = vmatprep.mubr.msk.bf16.mxu1 %vm452_vm2, %v1824_v55 }
 0x158   : > { %4875 = vmatmul.mubr.msk.bf16.gmra.mrb[24].mxu0 %vm452_vm2, %v3339_v39 }
 0x159   : > { %4878 = vmatprep.mubr.msk.bf16.mxu0 %vm452_vm2, %v3341_v29 }
 0x15d   : > { %4731 = vmatmul.mubr.msk.bf16.gmra.mrb[32].mxu1 %vm452_vm2, %v1833_v19 }
 0x160   : > { %4879 = vmatmul.mubr.msk.bf16.gmra.mrb[28].mxu0 %vm452_vm2, %v3343_v43 }
 0x161   : > { %4882 = vmatprep.mubr.msk.bf16.mxu0 %vm452_vm2, %v3345_v33 }
 0x168   : > { %4883 = vmatmul.mubr.msk.bf16.gmra.mrb[32].mxu0 %vm452_vm2, %v3347_v1 }
 0x1d0   : > { %v4662_v51 = vpop.f32.mrb[0].mxu1 }
 0x1d1   : > { %v1478_v62 = vpop.f32.mrb[1].mxu1 }
 0x1d2   : > { %v4663_v16 = vpop.f32.mrb[2].mxu1 }
 0x1d3   : > { %v1481_v14 = vpop.f32.mrb[3].mxu1 }
 0x1d8   : > { %v4666_v63 = vpop.f32.mrb[4].mxu1 }
 0x1d9   : > { %v1494_v57 = vpop.f32.mrb[5].mxu1 }
 0x1da   : > { %v4667_v9 = vpop.f32.mrb[6].mxu1 }
 0x1db   : > { %v1497_v17 = vpop.f32.mrb[7].mxu1 }
 0x1e0   : > { %v4670_v48 = vpop.f32.mrb[8].mxu1 }
 0x1e1   : > { %v1510_v60 = vpop.f32.mrb[9].mxu1 }
 0x1e2   : > { %v4671_v24 = vpop.f32.mrb[10].mxu1 }
 0x1e3   : > { %v1513_v54 = vpop.f32.mrb[11].mxu1 }
 0x1e8   : > { %v6243_v31 = vpop.f32.mrb[12].mxu1 }
 0x1e9   : > { %v6245_v0 = vpop.f32.mrb[13].mxu1 }
 0x1ea   : > { %v6247_v56 = vpop.f32.mrb[14].mxu1 }
 0x1eb   : > { %v6249_v13 = vpop.f32.mrb[15].mxu1 }
 0x1f0   : > { %v6251_v15 = vpop.f32.mrb[16].mxu1 }
 0x1f1   : > { %v6253_v58 = vpop.f32.mrb[17].mxu1 }
 0x1f2   : > { %v6255_v8 = vpop.f32.mrb[18].mxu1 }
 0x1f3   : > { %v6257_v34 = vpop.f32.mrb[19].mxu1 }
 0x1fb   : > { %v4852_v38 = vpop.f32.mrb[0].mxu0 }
 0x1fc   : > { %v4888_v7 = vadd.f32 %v4852_v38, %v4662_v51  ;;  %v3439_v4 = vpop.f32.mrb[1].mxu0 }
 0x1fd   : > { %v4889_v11 = vadd.f32 %v3439_v4, %v1478_v62  ;;  %v4853_v6 = vpop.f32.mrb[2].mxu0 }
 0x1fe   : > { %v3627_v12 = vadd.f32 %v4888_v7, %v6262_v49  ;;  %v4890_v30 = vadd.f32 %v4853_v6, %v4663_v16  ;;  %v3442_v42 = vpop.f32.mrb[3].mxu0 }
 0x1ff   : > { %v3625_v46 = vadd.f32 %v4889_v11, %v6262_v49  ;;  %v4891_v50 = vadd.f32 %v3442_v42, %v1481_v14 }
 0x200   : > { %v3628_v47 = vadd.f32 %v4890_v30, %v6262_v49  ;;  %v3663_v18 = vmax.f32 %v3627_v12, 0.0 }
 0x201   : > { %v3626_v37 = vadd.f32 %v4891_v50, %v6262_v49  ;;  %v3661_v10 = vmax.f32 %v3625_v46, 0.0 }
 0x202   : > { %v3664_v52 = vmax.f32 %v3628_v47, 0.0 }
 0x203   : > { %v3662_v25 = vmax.f32 %v3626_v37, 0.0  ;;  %v4856_v45 = vpop.f32.mrb[4].mxu0 }
 0x204   : > { %v4274_v22 = vpack.c.bf16 %v3664_v52, %v3663_v18  ;;  %v4892_v23 = vadd.f32 %v4856_v45, %v4666_v63  ;;  %v3455_v35 = vpop.f32.mrb[5].mxu0 }
 0x205   : > { %v4269_v53 = vpack.c.bf16 %v3662_v25, %v3661_v10  ;;  %v4893_v26 = vadd.f32 %v3455_v35, %v1494_v57  ;;  %v4857_v28 = vpop.f32.mrb[6].mxu0 }
 0x206   : > { %4356 = vst [vmem:[%s6271_s8 + $0x8] sm:$0xff] %v4274_v22   ;;  %v3631_v41 = vadd.f32 %v4892_v23, %v6262_v49  ;;  %v4894_v2 = vadd.f32 %v4857_v28, %v4667_v9  ;;  %v3458_v27 = vpop.f32.mrb[7].mxu0 }
 0x207   : > { %4270 = vst [vmem:[%s6271_s8] sm:$0xff] %v4269_v53   ;;  %v3629_v5 = vadd.f32 %v4893_v26, %v6262_v49  ;;  %v4895_v32 = vadd.f32 %v3458_v27, %v1497_v17 }
 0x208   : > { %v3632_v20 = vadd.f32 %v4894_v2, %v6262_v49  ;;  %v3667_v44 = vmax.f32 %v3631_v41, 0.0 }
 0x209   : > { %v3630_v21 = vadd.f32 %v4895_v32, %v6262_v49  ;;  %v3665_v40 = vmax.f32 %v3629_v5, 0.0 }
 0x20a   : > { %v3668_v55 = vmax.f32 %v3632_v20, 0.0 }
 0x20b   : > { %v3666_v59 = vmax.f32 %v3630_v21, 0.0  ;;  %v4860_v39 = vpop.f32.mrb[8].mxu0 }
 0x20c   : > { %v4284_v29 = vpack.c.bf16 %v3668_v55, %v3667_v44  ;;  %v4896_v19 = vadd.f32 %v4860_v39, %v4670_v48  ;;  %v3471_v36 = vpop.f32.mrb[9].mxu0 }
 0x20d   : > { %v4279_v3 = vpack.c.bf16 %v3666_v59, %v3665_v40  ;;  %v4897_v43 = vadd.f32 %v3471_v36, %v1510_v60  ;;  %v4861_v33 = vpop.f32.mrb[10].mxu0 }
 0x20e   : > { %4358 = vst [vmem:[%s6271_s8 + $0x18] sm:$0xff] %v4284_v29   ;;  %v3635_v61 = vadd.f32 %v4896_v19, %v6262_v49  ;;  %v4898_v1 = vadd.f32 %v4861_v33, %v4671_v24  ;;  %v3474_v51 = vpop.f32.mrb[11].mxu0 }
 0x20f   : > { %4357 = vst [vmem:[%s6271_s8 + $0x10] sm:$0xff] %v4279_v3   ;;  %v3633_v62 = vadd.f32 %v4897_v43, %v6262_v49  ;;  %v4899_v16 = vadd.f32 %v3474_v51, %v1513_v54 }
 0x210   : > { %v3636_v14 = vadd.f32 %v4898_v1, %v6262_v49  ;;  %v3671_v57 = vmax.f32 %v3635_v61, 0.0 }
 0x211   : > { %v3634_v63 = vadd.f32 %v4899_v16, %v6262_v49  ;;  %v3669_v17 = vmax.f32 %v3633_v62, 0.0 }
 0x212   : > { %v3672_v9 = vmax.f32 %v3636_v14, 0.0 }
 0x213   : > { %v3670_v48 = vmax.f32 %v3634_v63, 0.0  ;;  %v4864_v60 = vpop.f32.mrb[12].mxu0 }
 0x214   : > { %v4294_v38 = vpack.c.bf16 %v3672_v9, %v3671_v57  ;;  %v4900_v7 = vadd.f32 %v4864_v60, %v6243_v31  ;;  %v3487_v24 = vpop.f32.mrb[13].mxu0 }
 0x215   : > { %v4289_v4 = vpack.c.bf16 %v3670_v48, %v3669_v17  ;;  %v4901_v11 = vadd.f32 %v3487_v24, %v6245_v0  ;;  %v4865_v6 = vpop.f32.mrb[14].mxu0 }
 0x216   : > { %4360 = vst [vmem:[%s6271_s8 + $0x28] sm:$0xff] %v4294_v38   ;;  %v3639_v54 = vadd.f32 %v4900_v7, %v6262_v49  ;;  %v4902_v12 = vadd.f32 %v4865_v6, %v6247_v56  ;;  %v3490_v30 = vpop.f32.mrb[15].mxu0 }
 0x217   : > { %4359 = vst [vmem:[%s6271_s8 + $0x20] sm:$0xff] %v4289_v4   ;;  %v3637_v46 = vadd.f32 %v4901_v11, %v6262_v49  ;;  %v4903_v50 = vadd.f32 %v3490_v30, %v6249_v13 }
 0x218   : > { %v4720_v42 = vpop.f32.mrb[20].mxu1  ;;  %v3640_v31 = vadd.f32 %v4902_v12, %v6262_v49  ;;  %v3675_v52 = vmax.f32 %v3639_v54, 0.0 }
 0x219   : > { %v2005_v47 = vpop.f32.mrb[21].mxu1  ;;  %v3638_v0 = vadd.f32 %v4903_v50, %v6262_v49  ;;  %v3673_v25 = vmax.f32 %v3637_v46, 0.0 }
 0x21a   : > { %v4721_v37 = vpop.f32.mrb[22].mxu1  ;;  %v3676_v10 = vmax.f32 %v3640_v31, 0.0 }
 0x21b   : > { %v2008_v18 = vpop.f32.mrb[23].mxu1  ;;  %v3674_v56 = vmax.f32 %v3638_v0, 0.0  ;;  %v4868_v45 = vpop.f32.mrb[16].mxu0 }
 0x21c   : > { %v4304_v22 = vpack.c.bf16 %v3676_v10, %v3675_v52  ;;  %v4904_v23 = vadd.f32 %v4868_v45, %v6251_v15  ;;  %v3503_v35 = vpop.f32.mrb[17].mxu0 }
 0x21d   : > { %v4299_v53 = vpack.c.bf16 %v3674_v56, %v3673_v25  ;;  %v4905_v13 = vadd.f32 %v3503_v35, %v6253_v58  ;;  %v4869_v26 = vpop.f32.mrb[18].mxu0 }
 0x21e   : > { %4362 = vst [vmem:[%s6271_s8 + $0x38] sm:$0xff] %v4304_v22   ;;  %v3643_v28 = vadd.f32 %v4904_v23, %v6262_v49  ;;  %v4906_v41 = vadd.f32 %v4869_v26, %v6255_v8  ;;  %v3506_v2 = vpop.f32.mrb[19].mxu0 }
 0x21f   : > { %4361 = vst [vmem:[%s6271_s8 + $0x30] sm:$0xff] %v4299_v53   ;;  %v3641_v5 = vadd.f32 %v4905_v13, %v6262_v49  ;;  %v4907_v32 = vadd.f32 %v3506_v2, %v6257_v34 }
 0x220   : > { %v4724_v27 = vpop.f32.mrb[24].mxu1  ;;  %v3644_v15 = vadd.f32 %v4906_v41, %v6262_v49  ;;  %v3679_v55 = vmax.f32 %v3643_v28, 0.0 }
 0x221   : > { %v2021_v20 = vpop.f32.mrb[25].mxu1  ;;  %v3642_v58 = vadd.f32 %v4907_v32, %v6262_v49  ;;  %v3677_v59 = vmax.f32 %v3641_v5, 0.0 }
 0x222   : > { %v4725_v21 = vpop.f32.mrb[26].mxu1  ;;  %v3680_v40 = vmax.f32 %v3644_v15, 0.0 }
 0x223   : > { %v2024_v44 = vpop.f32.mrb[27].mxu1  ;;  %v3678_v8 = vmax.f32 %v3642_v58, 0.0  ;;  %v4872_v39 = vpop.f32.mrb[20].mxu0 }
 0x224   : > { %v4314_v29 = vpack.c.bf16 %v3680_v40, %v3679_v55  ;;  %v4908_v19 = vadd.f32 %v4872_v39, %v4720_v42  ;;  %v3519_v36 = vpop.f32.mrb[21].mxu0 }
 0x225   : > { %v4309_v3 = vpack.c.bf16 %v3678_v8, %v3677_v59  ;;  %v4909_v43 = vadd.f32 %v3519_v36, %v2005_v47  ;;  %v4873_v34 = vpop.f32.mrb[22].mxu0 }
 0x226   : > { %4364 = vst [vmem:[%s6271_s8 + $0x48] sm:$0xff] %v4314_v29   ;;  %v3647_v33 = vadd.f32 %v4908_v19, %v6262_v49  ;;  %v4910_v61 = vadd.f32 %v4873_v34, %v4721_v37  ;;  %v3522_v1 = vpop.f32.mrb[23].mxu0 }
 0x227   : > { %4363 = vst [vmem:[%s6271_s8 + $0x40] sm:$0xff] %v4309_v3   ;;  %v3645_v62 = vadd.f32 %v4909_v43, %v6262_v49  ;;  %v4911_v16 = vadd.f32 %v3522_v1, %v2008_v18 }
 0x228   : > { %v4728_v51 = vpop.f32.mrb[28].mxu1  ;;  %v3648_v63 = vadd.f32 %v4910_v61, %v6262_v49  ;;  %v3683_v48 = vmax.f32 %v3647_v33, 0.0 }
 0x229   : > { %v2037_v14 = vpop.f32.mrb[29].mxu1  ;;  %v3646_v9 = vadd.f32 %v4911_v16, %v6262_v49  ;;  %v3681_v38 = vmax.f32 %v3645_v62, 0.0 }
 0x22a   : > { %v4729_v57 = vpop.f32.mrb[30].mxu1  ;;  %v3684_v60 = vmax.f32 %v3648_v63, 0.0 }
 0x22b   : > { %v2040_v17 = vpop.f32.mrb[31].mxu1  ;;  %v3682_v7 = vmax.f32 %v3646_v9, 0.0  ;;  %v4876_v24 = vpop.f32.mrb[24].mxu0 }
 0x22c   : > { %v4324_v4 = vpack.c.bf16 %v3684_v60, %v3683_v48  ;;  %v4912_v11 = vadd.f32 %v4876_v24, %v4724_v27  ;;  %v3535_v6 = vpop.f32.mrb[25].mxu0 }
 0x22d   : > { %v4319_v54 = vpack.c.bf16 %v3682_v7, %v3681_v38  ;;  %v4913_v12 = vadd.f32 %v3535_v6, %v2021_v20  ;;  %v4877_v30 = vpop.f32.mrb[26].mxu0 }
 0x22e   : > { %4366 = vst [vmem:[%s6271_s8 + $0x58] sm:$0xff] %v4324_v4   ;;  %v3651_v42 = vadd.f32 %v4912_v11, %v6262_v49  ;;  %v4914_v46 = vadd.f32 %v4877_v30, %v4725_v21  ;;  %v3538_v50 = vpop.f32.mrb[27].mxu0 }
 0x22f   : > { %4365 = vst [vmem:[%s6271_s8 + $0x50] sm:$0xff] %v4319_v54   ;;  %v3649_v31 = vadd.f32 %v4913_v12, %v6262_v49  ;;  %v4915_v37 = vadd.f32 %v3538_v50, %v2024_v44 }
 0x230   : > { %v4732_v47 = vpop.f32.mrb[32].mxu1  ;;  %v3652_v18 = vadd.f32 %v4914_v46, %v6262_v49  ;;  %v3687_v56 = vmax.f32 %v3651_v42, 0.0 }
 0x231   : > { %v2053_v0 = vpop.f32.mrb[33].mxu1  ;;  %v3650_v10 = vadd.f32 %v4915_v37, %v6262_v49  ;;  %v3685_v22 = vmax.f32 %v3649_v31, 0.0 }
 0x232   : > { %v4733_v52 = vpop.f32.mrb[34].mxu1  ;;  %v3688_v45 = vmax.f32 %v3652_v18, 0.0 }
 0x233   : > { %v2056_v25 = vpop.f32.mrb[35].mxu1  ;;  %v3686_v23 = vmax.f32 %v3650_v10, 0.0  ;;  %v4880_v35 = vpop.f32.mrb[28].mxu0 }
 0x234   : > { %v4334_v53 = vpack.c.bf16 %v3688_v45, %v3687_v56  ;;  %v4916_v13 = vadd.f32 %v4880_v35, %v4728_v51  ;;  %v3551_v26 = vpop.f32.mrb[29].mxu0 }
 0x235   : > { %v4329_v28 = vpack.c.bf16 %v3686_v23, %v3685_v22  ;;  %v4917_v41 = vadd.f32 %v3551_v26, %v2037_v14  ;;  %v4881_v2 = vpop.f32.mrb[30].mxu0 }
 0x236   : > { %4368 = vst [vmem:[%s6271_s8 + $0x68] sm:$0xff] %v4334_v53   ;;  %v3655_v27 = vadd.f32 %v4916_v13, %v6262_v49  ;;  %v4918_v5 = vadd.f32 %v4881_v2, %v4729_v57  ;;  %v3554_v32 = vpop.f32.mrb[31].mxu0 }
 0x237   : > { %4367 = vst [vmem:[%s6271_s8 + $0x60] sm:$0xff] %v4329_v28   ;;  %v3653_v20 = vadd.f32 %v4917_v41, %v6262_v49  ;;  %v4919_v15 = vadd.f32 %v3554_v32, %v2040_v17 }
 0x238   : > { %v3656_v21 = vadd.f32 %v4918_v5, %v6262_v49  ;;  %v3691_v44 = vmax.f32 %v3655_v27, 0.0 }
 0x239   : > { %v3654_v58 = vadd.f32 %v4919_v15, %v6262_v49  ;;  %v3689_v40 = vmax.f32 %v3653_v20, 0.0 }
 0x23a   : > { %v3692_v55 = vmax.f32 %v3656_v21, 0.0 }
 0x23b   : > { %v3690_v59 = vmax.f32 %v3654_v58, 0.0  ;;  %v4884_v8 = vpop.f32.mrb[32].mxu0 }
 0x23c   : > { %v4344_v39 = vpack.c.bf16 %v3692_v55, %v3691_v44  ;;  %v4920_v29 = vadd.f32 %v4884_v8, %v4732_v47  ;;  %v3567_v19 = vpop.f32.mrb[33].mxu0 }
 0x23d   : > { %v4339_v36 = vpack.c.bf16 %v3690_v59, %v3689_v40  ;;  %v4921_v3 = vadd.f32 %v3567_v19, %v2053_v0  ;;  %v4885_v43 = vpop.f32.mrb[34].mxu0 }
 0x23e   : > { %4370 = vst [vmem:[%s6271_s8 + $0x78] sm:$0xff] %v4344_v39   ;;  %v3659_v34 = vadd.f32 %v4920_v29, %v6262_v49  ;;  %v4922_v33 = vadd.f32 %v4885_v43, %v4733_v52  ;;  %v3570_v61 = vpop.f32.mrb[35].mxu0 }
 0x23f   : > { %4369 = vst [vmem:[%s6271_s8 + $0x70] sm:$0xff] %v4339_v36   ;;  %v3657_v1 = vadd.f32 %v4921_v3, %v6262_v49  ;;  %v4923_v51 = vadd.f32 %v3570_v61, %v2056_v25 }
 0x240   : > { %v3660_v62 = vadd.f32 %v4922_v33, %v6262_v49  ;;  %v3695_v14 = vmax.f32 %v3659_v34, 0.0 }
 0x241   : > { %v3658_v16 = vadd.f32 %v4923_v51, %v6262_v49  ;;  %v3693_v57 = vmax.f32 %v3657_v1, 0.0 }
 0x242   : > { %v3696_v63 = vmax.f32 %v3660_v62, 0.0 }
 0x243   : > { %v3694_v9 = vmax.f32 %v3658_v16, 0.0 }
 0x244   : > { %v4354_v17 = vpack.c.bf16 %v3696_v63, %v3695_v14 }
 0x245   : > { %v4349_v48 = vpack.c.bf16 %v3694_v9, %v3693_v57 }
 0x246   : > { %4372 = vst [vmem:[%s6271_s8 + $0x88] sm:$0xff] %v4354_v17  }
 0x247   : > { %4371 = vst [vmem:[%s6271_s8 + $0x80] sm:$0xff] %v4349_v48  }
 0x248   : > { %5316 = shalt.err (!%p5313_p3)
}
 0x249   : > { %s5317_s27 = scalar_lea.hbm %s6334_s19, 2304  ;;  %s5321_s30 = scalar_lea.hbm %s6386_s3, 4608 }
 0x24a   : > { %p5318_p4 = scmp.ne.s32.totalorder %s6334_s19, %s5317_s27  ;;  %p5322_p9 = scmp.lt.u32.totalorder %s6334_s19, %s6386_s3 }
 0x24b   : > { %p5323_p10 = scmp.lt.u32.totalorder %s5321_s30, %s5317_s27  ;;  %p5325_p12 = scmp.lt.u32.totalorder %s5317_s27, %s6334_s19 }
 0x24c   : > { %p5319_p7 = pnand %p5318_p4, %p5428_p5 }
 0x24d   : > { %p5324_p11 = por %p5323_p10, %p5322_p9 }
 0x24e   : > { %p5320_p8 = pneg %p5319_p7 }
 0x24f   : > { %p5326_p13 = por %p5325_p12, %p5324_p11 }
 0x251   : > { %p5327_p0 = pnand %p5326_p13, %p5320_p8 }
 0x253   : > { %5330 = shalt.err (!%p5327_p0)
}
 0x254   : > { %s5368_s6 = smov 64   ;;  %s5369_s7 = smov 4  }
 0x255   : > { %5189 = dma.vmem_to_hbm [thread:$0]  (%p5428_p5), %s6336_s10, 2304, %s6334_s19, %s6342_s16, %s5368_s6, %s5368_s6, %s5369_s7  }
 0x256 PF: > { %p5195_p1 = scmp.ge.s32.totalorder %s5365_s15, 2  ;;  %s3906_s8 = sand.u32 1, %s5353_s12  }
 0x257   : > { %s3907_s9 = scalar_lea.sflag [#allocation3], %s3906_s8 }
 0x258   : > { %p5192_p2 = pnand %p5195_p1, %p5432_p6 }
 0x25a   : > { %5348 = dma.done.wait (!%p5192_p2), %s3907_s9, 2304  }
 0x25b   : > { %5350 = vsyncadd (!%p5192_p2), %s3907_s9, 4294964992  ;;  %p13_p3 = scmp.ge.s32.totalorder %s5415_s18, 4   ;;  %s6389_s12 = smov %s5357_s13 }
 0x25c   : > { %s6390_s13 = smov %s5361_s14  ;;  %s6391_s14 = smov %s5426_s21 }
 0x25d   : > { %s6392_s15 = smov %s5415_s18  ;;  %15 = sbr.rel (!%p13_p3) target bundleno = 3 (0x3), region = 75 }
 0x264   :  { %3912 = vsyncpa [#allocation3], 1 }
 0x265   :  { %3914 = vsyncpa [#allocation3 + $0x1], 1 }

</bundles_post_ra>
